<compile_context>
chip_gen: v5e
topology: v5e:2x2
jax: 0.10.0
libtpu: 0.0.40
codegen_flags: <defaults>
</compile_context>

<pallas_src>
import functools

import jax
import jax.numpy as jnp
from jax.experimental import pallas as pl
from jax.experimental.pallas import tpu as pltpu


# ----------------------------- configuration ------------------------------
# A small "vit_base_patch16_224"-style backbone, scaled down so the example runs quickly.
IMG = 32            # input spatial size
IN_CH = 3           # RGB
PATCH = 16
EMBED_DIM = 64
DEPTH = 2
NUM_HEADS = 4
HEAD_DIM = EMBED_DIM // NUM_HEADS
MLP_HIDDEN = 4 * EMBED_DIM
FEATURE_DIM = 32    # Conv2d 1x1 projection output channels (feature_dim)
LN_EPS = 1e-6       # timm ViT LayerNorm eps


# --------------------------- in-kernel helpers ------------------------------
def _layernorm(x, g, b):
    mean = jnp.mean(x, axis=-1, keepdims=True)
    xc = x - mean
    var = jnp.mean(xc * xc, axis=-1, keepdims=True)     # biased, like PyTorch LN
    return xc * jax.lax.rsqrt(var + LN_EPS) * g + b


def _erf(x):
    # Abramowitz & Stegun 7.1.26 polynomial (|err| < 1.5e-7): exact-erf GELU semantics
    # with ops that always lower on Mosaic (mul/add/div/exp/select).
    p = 0.3275911
    a1, a2, a3, a4, a5 = (0.254829592, -0.284496736, 1.421413741,
                          -1.453152027, 1.061405429)
    z = jnp.abs(x)
    t = 1.0 / (1.0 + p * z)
    poly = ((((a5 * t + a4) * t + a3) * t + a2) * t + a1) * t
    e = 1.0 - poly * jnp.exp(-z * z)
    return jnp.where(x < 0.0, -e, e)


def _gelu_exact(x):
    return 0.5 * x * (1.0 + _erf(x * 0.7071067811865476))


# ------------------------------ fused kernel --------------------------------
def _vit_block_kernel(
    patches_ref, pos_cls_ref, mask_ref, patch_w_ref,
    ln1_g_ref, ln1_b_ref, qkv_w_ref, qkv_b_ref, attn_w_ref, attn_b_ref,
    ln2_g_ref, ln2_b_ref, fc1_w_ref, fc1_b_ref, fc2_w_ref, fc2_b_ref,
    norm_g_ref, norm_b_ref, head_w_ref, head_b_ref,
    bev_ref, x_ref,
    *, seq_pad, n_patches, block_batch, num_heads, head_dim, d_model):
    """One (batch-block, depth-layer) grid step.  The residual stream for the whole
    batch block lives in the VMEM scratch `x_ref` and is carried across depth steps."""
    f32 = jnp.float32
    bf16 = jnp.bfloat16
    d = pl.program_id(1)
    m_rows = block_batch * seq_pad

    # ---- patch embedding: only on the first depth step of each batch block ----
    # cls token, positional embedding and patch-embed bias are pre-folded into pos_cls.
    @pl.when(d == 0)
    def _():
        p = patches_ref[0]                                           # (M, cpp) bf16
        x_ref[...] = (jnp.dot(p, patch_w_ref[...],
                              preferred_element_type=f32) + pos_cls_ref[...])

    x = x_ref[...]                                                   # (M, D) f32
    key_mask = mask_ref[...]                                         # (M, M) f32, block-diag
    scale = head_dim ** -0.5

    # ---- multi-head self-attention (pre-norm, fused residual) ----
    h = _layernorm(x, ln1_g_ref[0], ln1_b_ref[0]).astype(bf16)
    qkv = jnp.dot(h, qkv_w_ref[0], preferred_element_type=f32) + qkv_b_ref[0]
    w_o = attn_w_ref[0]                                              # (D, D) bf16
    attn_out = jnp.zeros((m_rows, d_model), f32)
    for hh in range(num_heads):
        lo = hh * head_dim
        q = qkv[:, lo:lo + head_dim].astype(bf16)
        k = qkv[:, d_model + lo:d_model + lo + head_dim].astype(bf16)
        v = qkv[:, 2 * d_model + lo:2 * d_model + lo + head_dim].astype(bf16)
        s = jax.lax.dot_general(q, k, (((1,), (1,)), ((), ())),
                                preferred_element_type=f32)
        s = s * scale + key_mask                    # mask pad keys + cross-image blocks
        s = s - jnp.max(s, axis=-1, keepdims=True)
        pr = jnp.exp(s)
        pr = pr / jnp.sum(pr, axis=-1, keepdims=True)                # exact softmax
        o_h = jnp.dot(pr.astype(bf16), v, preferred_element_type=f32)
        # accumulate straight through the sublane-aligned row-slice of the proj weight
        attn_out = attn_out + jnp.dot(o_h.astype(bf16), w_o[lo:lo + head_dim, :],
                                      preferred_element_type=f32)
    x = x + attn_out + attn_b_ref[0]

    # ---- MLP (pre-norm, fused exact-erf GELU + residual) ----
    h = _layernorm(x, ln2_g_ref[0], ln2_b_ref[0]).astype(bf16)
    h = jnp.dot(h, fc1_w_ref[0], preferred_element_type=f32) + fc1_b_ref[0]
    h = _gelu_exact(h).astype(bf16)
    x = x + jnp.dot(h, fc2_w_ref[0], preferred_element_type=f32) + fc2_b_ref[0]

    x_ref[...] = x                                  # carry residual to next depth step

    # ---- epilogue: final norm, drop cls+pad rows, 1x1-conv projection ----
    @pl.when(d == pl.num_programs(1) - 1)
    def _():
        xn = _layernorm(x, norm_g_ref[...], norm_b_ref[...]).astype(bf16)
        proj = (jnp.dot(xn, head_w_ref[...], preferred_element_type=f32)
                + head_b_ref[...])                                   # (M, feat)
        for b in range(block_batch):                # sublane-aligned static slices
            bev_ref[b] = proj[b * seq_pad:b * seq_pad + n_patches, :]


# ------------------------------ parameters ---------------------------------
def init_params(key):
    ks = jax.random.split(key, 8)
    nrm = lambda k, shape: 0.02 * jax.random.normal(k, shape, jnp.float32)
    seq = (IMG // PATCH) ** 2 + 1
    return {
        "patch_w": nrm(ks[0], (IN_CH * PATCH * PATCH, EMBED_DIM)),  # conv(k=P, s=P)
        "patch_b": jnp.zeros((EMBED_DIM,), jnp.float32),
        "cls_token": nrm(ks[1], (1, 1, EMBED_DIM)),
        "pos_embed": nrm(ks[2], (1, seq, EMBED_DIM)),
        "ln1_g": jnp.ones((DEPTH, EMBED_DIM), jnp.float32),
        "ln1_b": jnp.zeros((DEPTH, EMBED_DIM), jnp.float32),
        "qkv_w": nrm(ks[3], (DEPTH, EMBED_DIM, 3 * EMBED_DIM)),
        "qkv_b": jnp.zeros((DEPTH, 3 * EMBED_DIM), jnp.float32),
        "attn_w": nrm(ks[4], (DEPTH, EMBED_DIM, EMBED_DIM)),
        "attn_b": jnp.zeros((DEPTH, EMBED_DIM), jnp.float32),
        "ln2_g": jnp.ones((DEPTH, EMBED_DIM), jnp.float32),
        "ln2_b": jnp.zeros((DEPTH, EMBED_DIM), jnp.float32),
        "fc1_w": nrm(ks[5], (DEPTH, EMBED_DIM, MLP_HIDDEN)),
        "fc1_b": jnp.zeros((DEPTH, MLP_HIDDEN), jnp.float32),
        "fc2_w": nrm(ks[6], (DEPTH, MLP_HIDDEN, EMBED_DIM)),
        "fc2_b": jnp.zeros((DEPTH, EMBED_DIM), jnp.float32),
        "norm_g": jnp.ones((EMBED_DIM,), jnp.float32),
        "norm_b": jnp.zeros((EMBED_DIM,), jnp.float32),
        "head_w": nrm(ks[7], (EMBED_DIM, FEATURE_DIM)),             # 1x1 conv
        "head_b": jnp.zeros((FEATURE_DIM,), jnp.float32),
    }


# ------------------------------ forward pass --------------------------------
def overhead_encoder(params, uav_image, block_batch=None):
    """OverheadEncoder.forward: single pallas_call, grid = (batch blocks, depth)."""
    B, C, H, W = uav_image.shape
    hf, wf = H // PATCH, W // PATCH
    n = hf * wf
    seq = n + 1
    seq_pad = ((seq + 7) // 8) * 8                  # sublane-aligned token rows / image
    cpp = C * PATCH * PATCH
    d_model = params["patch_w"].shape[-1]
    depth = params["qkv_w"].shape[0]
    mlp = params["fc1_w"].shape[-1]
    feat = params["head_w"].shape[-1]
    head_dim = d_model // NUM_HEADS

    if block_batch is None:
        # Pack as many images per grid step as possible while keeping >=2 parallel grid
        # steps when B allows it (so v7x's two TensorCores both get work).  On single-TC
        # chips (v5e/v6e) extra steps are pure overhead, so small batches fold into one.
        block_batch = B // 2 if (B % 2 == 0 and B >= 4) else B
    assert B % block_batch == 0
    num_bb = B // block_batch
    m_rows = block_batch * seq_pad                  # MXU M dimension for every matmul

    f32, bf16 = jnp.float32, jnp.bfloat16
    bf = lambda a: a.astype(bf16)

    # ---- tiny one-off layout plumbing (XLA): patch flatten, packing, mask ----
    patches = (uav_image.reshape(B, C, hf, PATCH, wf, PATCH)
               .transpose(0, 2, 4, 1, 3, 5)         # (B, hf, wf, C, P, P) conv weight order
               .reshape(B, n, cpp))
    patches_pad = jnp.zeros((B, seq_pad, cpp), bf16)
    patches_pad = patches_pad.at[:, :n, :].set(patches.astype(bf16))  # cls slot = row n
    patches_pack = patches_pad.reshape(num_bb, m_rows, cpp)

    # cls token on the LAST valid row so epilogue token slices start at aligned row 0;
    # positional embedding + patch-embed bias pre-folded; tiled across the batch block.
    pos = params["pos_embed"][0]                    # (seq, D)
    pos_cls = jnp.zeros((seq_pad, d_model), f32)
    pos_cls = pos_cls.at[:n].set(pos[1:] + params["patch_b"])
    pos_cls = pos_cls.at[n].set(params["cls_token"][0, 0] + pos[0])
    pos_cls = jnp.tile(pos_cls, (block_batch, 1))   # (m_rows, D)

    # Block-diagonal additive key mask: queries only see valid tokens of their own image.
    ids = jnp.arange(m_rows)
    same_img = (ids[:, None] // seq_pad) == (ids[None, :] // seq_pad)
    col_valid = (ids[None, :] % seq_pad) < seq
    key_mask = jnp.where(same_img & col_valid, 0.0, -1e30).astype(f32)  # (m_rows, m_rows)

    kernel = functools.partial(
        _vit_block_kernel, seq_pad=seq_pad, n_patches=n, block_batch=block_batch,
        num_heads=NUM_HEADS, head_dim=head_dim, d_model=d_model)

    per_bb = lambda b, d: (b, 0, 0)                 # indexed by batch block
    per_d = lambda b, d: (d, 0, 0)                  # streamed per depth layer
    shared = lambda b, d: (0, 0)                    # resident / shared

    in_specs = [
        pl.BlockSpec((1, m_rows, cpp), per_bb),               # packed patches (bf16)
        pl.BlockSpec((m_rows, d_model), shared),              # cls/pos/patch-bias (f32)
        pl.BlockSpec((m_rows, m_rows), shared),               # block-diagonal key mask
        pl.BlockSpec((cpp, d_model), shared),                 # patch_w (bf16)
        pl.BlockSpec((1, 1, d_model), per_d),                 # ln1_g
        pl.BlockSpec((1, 1, d_model), per_d),                 # ln1_b
        pl.BlockSpec((1, d_model, 3 * d_model), per_d),       # qkv_w (bf16)
        pl.BlockSpec((1, 1, 3 * d_model), per_d),             # qkv_b
        pl.BlockSpec((1, d_model, d_model), per_d),           # attn proj w (bf16)
        pl.BlockSpec((1, 1, d_model), per_d),                 # attn proj b
        pl.BlockSpec((1, 1, d_model), per_d),                 # ln2_g
        pl.BlockSpec((1, 1, d_model), per_d),                 # ln2_b
        pl.BlockSpec((1, d_model, mlp), per_d),               # fc1_w (bf16)
        pl.BlockSpec((1, 1, mlp), per_d),                     # fc1_b
        pl.BlockSpec((1, mlp, d_model), per_d),                # fc2_w (bf16)
        pl.BlockSpec((1, 1, d_model), per_d),                  # fc2_b
        pl.BlockSpec((1, d_model), shared),                    # norm_g
        pl.BlockSpec((1, d_model), shared),                    # norm_b
        pl.BlockSpec((d_model, feat), shared),                 # head_w (bf16)
        pl.BlockSpec((1, feat), shared),                       # head_b
    ]

    # VMEM working set is tiny here (~1 MiB with double-buffered per-layer weights),
    # well under every generation's scoped default, so no explicit vmem_limit_bytes.
    bev = pl.pallas_call(
        kernel,
        grid=(num_bb, depth),
        in_specs=in_specs,
        out_specs=pl.BlockSpec((block_batch, n, feat), per_bb),
        out_shape=jax.ShapeDtypeStruct((B, n, feat), f32),
        scratch_shapes=[pltpu.VMEM((m_rows, d_model), f32)],   # residual stream carry
        compiler_params=pltpu.CompilerParams(
            # batch-block axis parallel (megacore on v7x); depth axis carries the
            # residual-stream scratch + write-at-last-step output -> arbitrary.
            dimension_semantics=("parallel", "arbitrary")),
    )(patches_pack, pos_cls, key_mask, bf(params["patch_w"]),
      params["ln1_g"][:, None, :], params["ln1_b"][:, None, :],
      bf(params["qkv_w"]), params["qkv_b"][:, None, :],
      bf(params["attn_w"]), params["attn_b"][:, None, :],
      params["ln2_g"][:, None, :], params["ln2_b"][:, None, :],
      bf(params["fc1_w"]), params["fc1_b"][:, None, :],
      bf(params["fc2_w"]), params["fc2_b"][:, None, :],
      params["norm_g"][None, :], params["norm_b"][None, :],
      bf(params["head_w"]), params["head_b"][None, :])

    return bev.reshape(B, hf, wf, feat).transpose(0, 3, 1, 2)             # NCHW


# ------------------------- pure-JAX reference (check) -----------------------
def _reference_forward(params, uav_image):
    B, C, H, W = uav_image.shape
    hf, wf = H // PATCH, W // PATCH
    n = hf * wf
    patches = (uav_image.reshape(B, C, hf, PATCH, wf, PATCH)
               .transpose(0, 2, 4, 1, 3, 5).reshape(B, n, C * PATCH * PATCH))
    tok = patches @ params["patch_w"] + params["patch_b"]
    cls = jnp.broadcast_to(params["cls_token"], (B, 1, EMBED_DIM))
    x = jnp.concatenate([cls, tok], axis=1) + params["pos_embed"]
    scale = HEAD_DIM ** -0.5

    def ln(y, g, b):
        m = y.mean(-1, keepdims=True)
        v = ((y - m) ** 2).mean(-1, keepdims=True)
        return (y - m) * jax.lax.rsqrt(v + LN_EPS) * g + b

    for d in range(DEPTH):
        h = ln(x, params["ln1_g"][d], params["ln1_b"][d])
        qkv = h @ params["qkv_w"][d] + params["qkv_b"][d]
        qkv = qkv.reshape(B, -1, 3, NUM_HEADS, HEAD_DIM).transpose(2, 0, 3, 1, 4)
        q, k, v = qkv[0], qkv[1], qkv[2]
        s = jnp.einsum("bhqd,bhkd->bhqk", q, k) * scale
        p = jax.nn.softmax(s, axis=-1)
        o = jnp.einsum("bhqk,bhkd->bhqd", p, v)
        o = o.transpose(0, 2, 1, 3).reshape(B, -1, EMBED_DIM)
        x = x + o @ params["attn_w"][d] + params["attn_b"][d]
        h = ln(x, params["ln2_g"][d], params["ln2_b"][d])
        h = jax.nn.gelu(h @ params["fc1_w"][d] + params["fc1_b"][d], approximate=False)
        x = x + h @ params["fc2_w"][d] + params["fc2_b"][d]
    x = ln(x, params["norm_g"], params["norm_b"])[:, 1:, :]
    bev = x @ params["head_w"] + params["head_b"]
    return bev.reshape(B, hf, wf, FEATURE_DIM).transpose(0, 3, 1, 2)


if __name__ == "__main__":
    key = jax.random.PRNGKey(0)
    pkey, xkey = jax.random.split(key)
    params = init_params(pkey)
    # batch=4 exercises both batch-packing (2 images / grid step) and a 2-step
    # parallel grid axis (one step per v7x TensorCore).
    uav_image = jax.random.normal(xkey, (4, IN_CH, IMG, IMG), jnp.float32)

    fwd = jax.jit(overhead_encoder)
    bev = jax.block_until_ready(fwd(params, uav_image))

    assert bev.shape == (4, FEATURE_DIM, IMG // PATCH, IMG // PATCH)
    assert bool(jnp.all(jnp.isfinite(bev)))

    ref = _reference_forward(params, uav_image)
    # bf16 MXU operands (f32 accumulation) dominate the small deviation from the
    # f32 reference; softmax divide and GELU erf are effectively exact.
    assert bool(jnp.allclose(bev, ref, rtol=2e-2, atol=2e-2)), \
        float(jnp.max(jnp.abs(bev - ref)))
    print("KERNEL_OK")
</pallas_src>

<mosaic_0001>
module attributes {stable_mosaic.version = 11 : i64} {
  func.func @_vit_block_kernel(%arg0: i32, %arg1: i32, %arg2: memref<1x16x768xbf16, #tpu.memory_space<vmem>>, %arg3: memref<16x64xf32, #tpu.memory_space<vmem>>, %arg4: memref<16x16xf32, #tpu.memory_space<vmem>>, %arg5: memref<768x64xbf16, #tpu.memory_space<vmem>>, %arg6: memref<1x1x64xf32, #tpu.memory_space<vmem>>, %arg7: memref<1x1x64xf32, #tpu.memory_space<vmem>>, %arg8: memref<1x64x192xbf16, #tpu.memory_space<vmem>>, %arg9: memref<1x1x192xf32, #tpu.memory_space<vmem>>, %arg10: memref<1x64x64xbf16, #tpu.memory_space<vmem>>, %arg11: memref<1x1x64xf32, #tpu.memory_space<vmem>>, %arg12: memref<1x1x64xf32, #tpu.memory_space<vmem>>, %arg13: memref<1x1x64xf32, #tpu.memory_space<vmem>>, %arg14: memref<1x64x256xbf16, #tpu.memory_space<vmem>>, %arg15: memref<1x1x256xf32, #tpu.memory_space<vmem>>, %arg16: memref<1x256x64xbf16, #tpu.memory_space<vmem>>, %arg17: memref<1x1x64xf32, #tpu.memory_space<vmem>>, %arg18: memref<1x64xf32, #tpu.memory_space<vmem>>, %arg19: memref<1x64xf32, #tpu.memory_space<vmem>>, %arg20: memref<64x32xbf16, #tpu.memory_space<vmem>>, %arg21: memref<1x32xf32, #tpu.memory_space<vmem>>, %arg22: memref<2x4x32xf32, #tpu.memory_space<vmem>>, %arg23: memref<16x64xf32, #tpu.memory_space<vmem>>) attributes {dimension_semantics = [#tpu.dimension_semantics<parallel>, #tpu.dimension_semantics<arbitrary>], iteration_bounds = array<i64: 2, 2>, scalar_prefetch = 0 : i64, scratch_operands = 1 : i64, tpu.core_type = #tpu.core_type<tc>, window_params = [{transform_indices = @transform_0, window_bounds = array<i64: 1, 16, 768>}, {pipeline_mode = #tpu.pipeline_mode<synchronous>, transform_indices = @transform_1, window_bounds = array<i64: 16, 64>}, {pipeline_mode = #tpu.pipeline_mode<synchronous>, transform_indices = @transform_2, window_bounds = array<i64: 16, 16>}, {pipeline_mode = #tpu.pipeline_mode<synchronous>, transform_indices = @transform_3, window_bounds = array<i64: 768, 64>}, {transform_indices = @transform_4, window_bounds = array<i64: 1, 1, 64>}, {transform_indices = @transform_5, window_bounds = array<i64: 1, 1, 64>}, {transform_indices = @transform_6, window_bounds = array<i64: 1, 64, 192>}, {transform_indices = @transform_7, window_bounds = array<i64: 1, 1, 192>}, {transform_indices = @transform_8, window_bounds = array<i64: 1, 64, 64>}, {transform_indices = @transform_9, window_bounds = array<i64: 1, 1, 64>}, {transform_indices = @transform_10, window_bounds = array<i64: 1, 1, 64>}, {transform_indices = @transform_11, window_bounds = array<i64: 1, 1, 64>}, {transform_indices = @transform_12, window_bounds = array<i64: 1, 64, 256>}, {transform_indices = @transform_13, window_bounds = array<i64: 1, 1, 256>}, {transform_indices = @transform_14, window_bounds = array<i64: 1, 256, 64>}, {transform_indices = @transform_15, window_bounds = array<i64: 1, 1, 64>}, {pipeline_mode = #tpu.pipeline_mode<synchronous>, transform_indices = @transform_16, window_bounds = array<i64: 1, 64>}, {pipeline_mode = #tpu.pipeline_mode<synchronous>, transform_indices = @transform_17, window_bounds = array<i64: 1, 64>}, {pipeline_mode = #tpu.pipeline_mode<synchronous>, transform_indices = @transform_18, window_bounds = array<i64: 64, 32>}, {pipeline_mode = #tpu.pipeline_mode<synchronous>, transform_indices = @transform_19, window_bounds = array<i64: 1, 32>}, {transform_indices = @transform_20, window_bounds = array<i64: 2, 4, 32>}]} {
    %c0_i32 = arith.constant 0 : i32
    %0 = arith.cmpi eq, %arg1, %c0_i32 : i32
    %1 = arith.extui %0 : i1 to i32
    %c0_i32_0 = arith.constant 0 : i32
    %2 = arith.cmpi ne, %1, %c0_i32_0 : i32
    scf.if %2 {
      %c0_95 = arith.constant 0 : index
      %c0_96 = arith.constant 0 : index
      %c0_97 = arith.constant 0 : index
      %230 = vector.load %arg2[%c0_95, %c0_96, %c0_97] : memref<1x16x768xbf16, #tpu.memory_space<vmem>>, vector<1x16x768xbf16>
      %231 = vector.shape_cast %230 : vector<1x16x768xbf16> to vector<16x768xbf16>
      %c0_98 = arith.constant 0 : index
      %c0_99 = arith.constant 0 : index
      %232 = vector.load %arg5[%c0_98, %c0_99] : memref<768x64xbf16, #tpu.memory_space<vmem>>, vector<768x64xbf16>
      %cst_100 = arith.constant dense<0.000000e+00> : vector<16x64xf32>
      %233 = tpu.matmul %231, %232, %cst_100 {dimension_numbers = #tpu.dot_dimension_numbers<[1], [0], [0], [1], [0, 0, 1, 1], [], []>} : vector<16x768xbf16>, vector<768x64xbf16>, vector<16x64xf32> -> vector<16x64xf32>
      %c0_101 = arith.constant 0 : index
      %c0_102 = arith.constant 0 : index
      %234 = vector.load %arg3[%c0_101, %c0_102] : memref<16x64xf32, #tpu.memory_space<vmem>>, vector<16x64xf32>
      %235 = arith.addf %233, %234 : vector<16x64xf32>
      %c0_103 = arith.constant 0 : index
      %c0_104 = arith.constant 0 : index
      %236 = vector.load %arg23[%c0_103, %c0_104] : memref<16x64xf32, #tpu.memory_space<vmem>>, vector<16x64xf32>
      tpu.vector_store %arg23[%c0_103, %c0_104], %235 {strides = array<i32>} : memref<16x64xf32, #tpu.memory_space<vmem>>, vector<16x64xf32>,
    } else {
    }
    %c0 = arith.constant 0 : index
    %c0_1 = arith.constant 0 : index
    %3 = vector.load %arg23[%c0, %c0_1] : memref<16x64xf32, #tpu.memory_space<vmem>>, vector<16x64xf32>
    %c0_2 = arith.constant 0 : index
    %c0_3 = arith.constant 0 : index
    %4 = vector.load %arg4[%c0_2, %c0_3] : memref<16x16xf32, #tpu.memory_space<vmem>>, vector<16x16xf32>
    %c0_4 = arith.constant 0 : index
    %c0_5 = arith.constant 0 : index
    %c0_6 = arith.constant 0 : index
    %5 = vector.load %arg6[%c0_4, %c0_5, %c0_6] : memref<1x1x64xf32, #tpu.memory_space<vmem>>, vector<1x1x64xf32>
    %6 = vector.shape_cast %5 : vector<1x1x64xf32> to vector<1x64xf32>
    %c0_7 = arith.constant 0 : index
    %c0_8 = arith.constant 0 : index
    %c0_9 = arith.constant 0 : index
    %7 = vector.load %arg7[%c0_7, %c0_8, %c0_9] : memref<1x1x64xf32, #tpu.memory_space<vmem>>, vector<1x1x64xf32>
    %8 = vector.shape_cast %7 : vector<1x1x64xf32> to vector<1x64xf32>
    %cst = arith.constant dense<0.000000e+00> : vector<16xf32>
    %9 = vector.multi_reduction <add>, %3, %cst [1] : vector<16x64xf32> to vector<16xf32>
    %10 = vector.shape_cast %9 : vector<16xf32> to vector<16x1xf32>
    %cst_10 = arith.constant 6.400000e+01 : f32
    %11 = vector.broadcast %cst_10 : f32 to vector<16x1xf32>
    %12 = arith.divf %10, %11 : vector<16x1xf32>
    %13 = vector.broadcast %12 : vector<16x1xf32> to vector<16x64xf32>
    %14 = arith.subf %3, %13 : vector<16x64xf32>
    %15 = arith.mulf %14, %14 : vector<16x64xf32>
    %cst_11 = arith.constant dense<0.000000e+00> : vector<16xf32>
    %16 = vector.multi_reduction <add>, %15, %cst_11 [1] : vector<16x64xf32> to vector<16xf32>
    %17 = vector.shape_cast %16 : vector<16xf32> to vector<16x1xf32>
    %cst_12 = arith.constant 6.400000e+01 : f32
    %18 = vector.broadcast %cst_12 : f32 to vector<16x1xf32>
    %19 = arith.divf %17, %18 : vector<16x1xf32>
    %cst_13 = arith.constant 9.99999997E-7 : f32
    %20 = vector.broadcast %cst_13 : f32 to vector<16x1xf32>
    %21 = arith.addf %19, %20 : vector<16x1xf32>
    %22 = math.rsqrt %21 : vector<16x1xf32>
    %23 = vector.broadcast %22 : vector<16x1xf32> to vector<16x64xf32>
    %24 = arith.mulf %14, %23 : vector<16x64xf32>
    %25 = vector.broadcast %6 : vector<1x64xf32> to vector<16x64xf32>
    %26 = arith.mulf %24, %25 : vector<16x64xf32>
    %27 = vector.broadcast %8 : vector<1x64xf32> to vector<16x64xf32>
    %28 = arith.addf %26, %27 : vector<16x64xf32>
    %29 = arith.truncf %28 : vector<16x64xf32> to vector<16x64xbf16>
    %c0_14 = arith.constant 0 : index
    %c0_15 = arith.constant 0 : index
    %c0_16 = arith.constant 0 : index
    %30 = vector.load %arg8[%c0_14, %c0_15, %c0_16] : memref<1x64x192xbf16, #tpu.memory_space<vmem>>, vector<1x64x192xbf16>
    %31 = vector.shape_cast %30 : vector<1x64x192xbf16> to vector<64x192xbf16>
    %cst_17 = arith.constant dense<0.000000e+00> : vector<16x192xf32>
    %32 = tpu.matmul %29, %31, %cst_17 {dimension_numbers = #tpu.dot_dimension_numbers<[1], [0], [0], [1], [0, 0, 1, 1], [], []>} : vector<16x64xbf16>, vector<64x192xbf16>, vector<16x192xf32> -> vector<16x192xf32>
    %c0_18 = arith.constant 0 : index
    %c0_19 = arith.constant 0 : index
    %c0_20 = arith.constant 0 : index
    %33 = vector.load %arg9[%c0_18, %c0_19, %c0_20] : memref<1x1x192xf32, #tpu.memory_space<vmem>>, vector<1x1x192xf32>
    %34 = vector.shape_cast %33 : vector<1x1x192xf32> to vector<1x192xf32>
    %35 = vector.broadcast %34 : vector<1x192xf32> to vector<16x192xf32>
    %36 = arith.addf %32, %35 : vector<16x192xf32>
    %c0_21 = arith.constant 0 : index
    %c0_22 = arith.constant 0 : index
    %c0_23 = arith.constant 0 : index
    %37 = vector.load %arg10[%c0_21, %c0_22, %c0_23] : memref<1x64x64xbf16, #tpu.memory_space<vmem>>, vector<1x64x64xbf16>
    %38 = vector.shape_cast %37 : vector<1x64x64xbf16> to vector<64x64xbf16>
    %cst_24 = arith.constant 0.000000e+00 : f32
    %39 = vector.broadcast %cst_24 : f32 to vector<16x64xf32>
    %40 = vector.extract_strided_slice %36 {offsets = [0, 0], sizes = [16, 16], strides = [1, 1]} : vector<16x192xf32> to vector<16x16xf32>
    %41 = arith.truncf %40 : vector<16x16xf32> to vector<16x16xbf16>
    %42 = vector.extract_strided_slice %36 {offsets = [0, 64], sizes = [16, 16], strides = [1, 1]} : vector<16x192xf32> to vector<16x16xf32>
    %43 = arith.truncf %42 : vector<16x16xf32> to vector<16x16xbf16>
    %44 = vector.extract_strided_slice %36 {offsets = [0, 128], sizes = [16, 16], strides = [1, 1]} : vector<16x192xf32> to vector<16x16xf32>
    %45 = arith.truncf %44 : vector<16x16xf32> to vector<16x16xbf16>
    %cst_25 = arith.constant dense<0.000000e+00> : vector<16x16xf32>
    %46 = tpu.matmul %41, %43, %cst_25 {dimension_numbers = #tpu.dot_dimension_numbers<[1], [1], [0], [0], [0, 0, 1, 0], [], []>} : vector<16x16xbf16>, vector<16x16xbf16>, vector<16x16xf32> -> vector<16x16xf32>
    %cst_26 = arith.constant 2.500000e-01 : f32
    %47 = vector.broadcast %cst_26 : f32 to vector<16x16xf32>
    %48 = arith.mulf %46, %47 : vector<16x16xf32>
    %49 = arith.addf %48, %4 : vector<16x16xf32>
    %cst_27 = arith.constant dense<0xFF800000> : vector<16xf32>
    %50 = vector.multi_reduction <maximumf>, %49, %cst_27 [1] : vector<16x16xf32> to vector<16xf32>
    %51 = vector.shape_cast %50 : vector<16xf32> to vector<16x1xf32>
    %52 = vector.broadcast %51 : vector<16x1xf32> to vector<16x16xf32>
    %53 = arith.subf %49, %52 : vector<16x16xf32>
    %54 = math.exp %53 : vector<16x16xf32>
    %cst_28 = arith.constant dense<0.000000e+00> : vector<16xf32>
    %55 = vector.multi_reduction <add>, %54, %cst_28 [1] : vector<16x16xf32> to vector<16xf32>
    %56 = vector.shape_cast %55 : vector<16xf32> to vector<16x1xf32>
    %57 = vector.broadcast %56 : vector<16x1xf32> to vector<16x16xf32>
    %58 = arith.divf %54, %57 : vector<16x16xf32>
    %59 = arith.truncf %58 : vector<16x16xf32> to vector<16x16xbf16>
    %cst_29 = arith.constant dense<0.000000e+00> : vector<16x16xf32>
    %60 = tpu.matmul %59, %45, %cst_29 {dimension_numbers = #tpu.dot_dimension_numbers<[1], [0], [0], [1], [0, 0, 1, 1], [], []>} : vector<16x16xbf16>, vector<16x16xbf16>, vector<16x16xf32> -> vector<16x16xf32>
    %61 = arith.truncf %60 : vector<16x16xf32> to vector<16x16xbf16>
    %62 = vector.extract_strided_slice %38 {offsets = [0, 0], sizes = [16, 64], strides = [1, 1]} : vector<64x64xbf16> to vector<16x64xbf16>
    %cst_30 = arith.constant dense<0.000000e+00> : vector<16x64xf32>
    %63 = tpu.matmul %61, %62, %cst_30 {dimension_numbers = #tpu.dot_dimension_numbers<[1], [0], [0], [1], [0, 0, 1, 1], [], []>} : vector<16x16xbf16>, vector<16x64xbf16>, vector<16x64xf32> -> vector<16x64xf32>
    %64 = arith.addf %39, %63 : vector<16x64xf32>
    %65 = vector.extract_strided_slice %36 {offsets = [0, 16], sizes = [16, 16], strides = [1, 1]} : vector<16x192xf32> to vector<16x16xf32>
    %66 = arith.truncf %65 : vector<16x16xf32> to vector<16x16xbf16>
    %67 = vector.extract_strided_slice %36 {offsets = [0, 80], sizes = [16, 16], strides = [1, 1]} : vector<16x192xf32> to vector<16x16xf32>
    %68 = arith.truncf %67 : vector<16x16xf32> to vector<16x16xbf16>
    %69 = vector.extract_strided_slice %36 {offsets = [0, 144], sizes = [16, 16], strides = [1, 1]} : vector<16x192xf32> to vector<16x16xf32>
    %70 = arith.truncf %69 : vector<16x16xf32> to vector<16x16xbf16>
    %cst_31 = arith.constant dense<0.000000e+00> : vector<16x16xf32>
    %71 = tpu.matmul %66, %68, %cst_31 {dimension_numbers = #tpu.dot_dimension_numbers<[1], [1], [0], [0], [0, 0, 1, 0], [], []>} : vector<16x16xbf16>, vector<16x16xbf16>, vector<16x16xf32> -> vector<16x16xf32>
    %cst_32 = arith.constant 2.500000e-01 : f32
    %72 = vector.broadcast %cst_32 : f32 to vector<16x16xf32>
    %73 = arith.mulf %71, %72 : vector<16x16xf32>
    %74 = arith.addf %73, %4 : vector<16x16xf32>
    %cst_33 = arith.constant dense<0xFF800000> : vector<16xf32>
    %75 = vector.multi_reduction <maximumf>, %74, %cst_33 [1] : vector<16x16xf32> to vector<16xf32>
    %76 = vector.shape_cast %75 : vector<16xf32> to vector<16x1xf32>
    %77 = vector.broadcast %76 : vector<16x1xf32> to vector<16x16xf32>
    %78 = arith.subf %74, %77 : vector<16x16xf32>
    %79 = math.exp %78 : vector<16x16xf32>
    %cst_34 = arith.constant dense<0.000000e+00> : vector<16xf32>
    %80 = vector.multi_reduction <add>, %79, %cst_34 [1] : vector<16x16xf32> to vector<16xf32>
    %81 = vector.shape_cast %80 : vector<16xf32> to vector<16x1xf32>
    %82 = vector.broadcast %81 : vector<16x1xf32> to vector<16x16xf32>
    %83 = arith.divf %79, %82 : vector<16x16xf32>
    %84 = arith.truncf %83 : vector<16x16xf32> to vector<16x16xbf16>
    %cst_35 = arith.constant dense<0.000000e+00> : vector<16x16xf32>
    %85 = tpu.matmul %84, %70, %cst_35 {dimension_numbers = #tpu.dot_dimension_numbers<[1], [0], [0], [1], [0, 0, 1, 1], [], []>} : vector<16x16xbf16>, vector<16x16xbf16>, vector<16x16xf32> -> vector<16x16xf32>
    %86 = arith.truncf %85 : vector<16x16xf32> to vector<16x16xbf16>
    %87 = vector.extract_strided_slice %38 {offsets = [16, 0], sizes = [16, 64], strides = [1, 1]} : vector<64x64xbf16> to vector<16x64xbf16>
    %cst_36 = arith.constant dense<0.000000e+00> : vector<16x64xf32>
    %88 = tpu.matmul %86, %87, %cst_36 {dimension_numbers = #tpu.dot_dimension_numbers<[1], [0], [0], [1], [0, 0, 1, 1], [], []>} : vector<16x16xbf16>, vector<16x64xbf16>, vector<16x64xf32> -> vector<16x64xf32>
    %89 = arith.addf %64, %88 : vector<16x64xf32>
    %90 = vector.extract_strided_slice %36 {offsets = [0, 32], sizes = [16, 16], strides = [1, 1]} : vector<16x192xf32> to vector<16x16xf32>
    %91 = arith.truncf %90 : vector<16x16xf32> to vector<16x16xbf16>
    %92 = vector.extract_strided_slice %36 {offsets = [0, 96], sizes = [16, 16], strides = [1, 1]} : vector<16x192xf32> to vector<16x16xf32>
    %93 = arith.truncf %92 : vector<16x16xf32> to vector<16x16xbf16>
    %94 = vector.extract_strided_slice %36 {offsets = [0, 160], sizes = [16, 16], strides = [1, 1]} : vector<16x192xf32> to vector<16x16xf32>
    %95 = arith.truncf %94 : vector<16x16xf32> to vector<16x16xbf16>
    %cst_37 = arith.constant dense<0.000000e+00> : vector<16x16xf32>
    %96 = tpu.matmul %91, %93, %cst_37 {dimension_numbers = #tpu.dot_dimension_numbers<[1], [1], [0], [0], [0, 0, 1, 0], [], []>} : vector<16x16xbf16>, vector<16x16xbf16>, vector<16x16xf32> -> vector<16x16xf32>
    %cst_38 = arith.constant 2.500000e-01 : f32
    %97 = vector.broadcast %cst_38 : f32 to vector<16x16xf32>
    %98 = arith.mulf %96, %97 : vector<16x16xf32>
    %99 = arith.addf %98, %4 : vector<16x16xf32>
    %cst_39 = arith.constant dense<0xFF800000> : vector<16xf32>
    %100 = vector.multi_reduction <maximumf>, %99, %cst_39 [1] : vector<16x16xf32> to vector<16xf32>
    %101 = vector.shape_cast %100 : vector<16xf32> to vector<16x1xf32>
    %102 = vector.broadcast %101 : vector<16x1xf32> to vector<16x16xf32>
    %103 = arith.subf %99, %102 : vector<16x16xf32>
    %104 = math.exp %103 : vector<16x16xf32>
    %cst_40 = arith.constant dense<0.000000e+00> : vector<16xf32>
    %105 = vector.multi_reduction <add>, %104, %cst_40 [1] : vector<16x16xf32> to vector<16xf32>
    %106 = vector.shape_cast %105 : vector<16xf32> to vector<16x1xf32>
    %107 = vector.broadcast %106 : vector<16x1xf32> to vector<16x16xf32>
    %108 = arith.divf %104, %107 : vector<16x16xf32>
    %109 = arith.truncf %108 : vector<16x16xf32> to vector<16x16xbf16>
    %cst_41 = arith.constant dense<0.000000e+00> : vector<16x16xf32>
    %110 = tpu.matmul %109, %95, %cst_41 {dimension_numbers = #tpu.dot_dimension_numbers<[1], [0], [0], [1], [0, 0, 1, 1], [], []>} : vector<16x16xbf16>, vector<16x16xbf16>, vector<16x16xf32> -> vector<16x16xf32>
    %111 = arith.truncf %110 : vector<16x16xf32> to vector<16x16xbf16>
    %112 = vector.extract_strided_slice %38 {offsets = [32, 0], sizes = [16, 64], strides = [1, 1]} : vector<64x64xbf16> to vector<16x64xbf16>
    %cst_42 = arith.constant dense<0.000000e+00> : vector<16x64xf32>
    %113 = tpu.matmul %111, %112, %cst_42 {dimension_numbers = #tpu.dot_dimension_numbers<[1], [0], [0], [1], [0, 0, 1, 1], [], []>} : vector<16x16xbf16>, vector<16x64xbf16>, vector<16x64xf32> -> vector<16x64xf32>
    %114 = arith.addf %89, %113 : vector<16x64xf32>
    %115 = vector.extract_strided_slice %36 {offsets = [0, 48], sizes = [16, 16], strides = [1, 1]} : vector<16x192xf32> to vector<16x16xf32>
    %116 = arith.truncf %115 : vector<16x16xf32> to vector<16x16xbf16>
    %117 = vector.extract_strided_slice %36 {offsets = [0, 112], sizes = [16, 16], strides = [1, 1]} : vector<16x192xf32> to vector<16x16xf32>
    %118 = arith.truncf %117 : vector<16x16xf32> to vector<16x16xbf16>
    %119 = vector.extract_strided_slice %36 {offsets = [0, 176], sizes = [16, 16], strides = [1, 1]} : vector<16x192xf32> to vector<16x16xf32>
    %120 = arith.truncf %119 : vector<16x16xf32> to vector<16x16xbf16>
    %cst_43 = arith.constant dense<0.000000e+00> : vector<16x16xf32>
    %121 = tpu.matmul %116, %118, %cst_43 {dimension_numbers = #tpu.dot_dimension_numbers<[1], [1], [0], [0], [0, 0, 1, 0], [], []>} : vector<16x16xbf16>, vector<16x16xbf16>, vector<16x16xf32> -> vector<16x16xf32>
    %cst_44 = arith.constant 2.500000e-01 : f32
    %122 = vector.broadcast %cst_44 : f32 to vector<16x16xf32>
    %123 = arith.mulf %121, %122 : vector<16x16xf32>
    %124 = arith.addf %123, %4 : vector<16x16xf32>
    %cst_45 = arith.constant dense<0xFF800000> : vector<16xf32>
    %125 = vector.multi_reduction <maximumf>, %124, %cst_45 [1] : vector<16x16xf32> to vector<16xf32>
    %126 = vector.shape_cast %125 : vector<16xf32> to vector<16x1xf32>
    %127 = vector.broadcast %126 : vector<16x1xf32> to vector<16x16xf32>
    %128 = arith.subf %124, %127 : vector<16x16xf32>
    %129 = math.exp %128 : vector<16x16xf32>
    %cst_46 = arith.constant dense<0.000000e+00> : vector<16xf32>
    %130 = vector.multi_reduction <add>, %129, %cst_46 [1] : vector<16x16xf32> to vector<16xf32>
    %131 = vector.shape_cast %130 : vector<16xf32> to vector<16x1xf32>
    %132 = vector.broadcast %131 : vector<16x1xf32> to vector<16x16xf32>
    %133 = arith.divf %129, %132 : vector<16x16xf32>
    %134 = arith.truncf %133 : vector<16x16xf32> to vector<16x16xbf16>
    %cst_47 = arith.constant dense<0.000000e+00> : vector<16x16xf32>
    %135 = tpu.matmul %134, %120, %cst_47 {dimension_numbers = #tpu.dot_dimension_numbers<[1], [0], [0], [1], [0, 0, 1, 1], [], []>} : vector<16x16xbf16>, vector<16x16xbf16>, vector<16x16xf32> -> vector<16x16xf32>
    %136 = arith.truncf %135 : vector<16x16xf32> to vector<16x16xbf16>
    %137 = vector.extract_strided_slice %38 {offsets = [48, 0], sizes = [16, 64], strides = [1, 1]} : vector<64x64xbf16> to vector<16x64xbf16>
    %cst_48 = arith.constant dense<0.000000e+00> : vector<16x64xf32>
    %138 = tpu.matmul %136, %137, %cst_48 {dimension_numbers = #tpu.dot_dimension_numbers<[1], [0], [0], [1], [0, 0, 1, 1], [], []>} : vector<16x16xbf16>, vector<16x64xbf16>, vector<16x64xf32> -> vector<16x64xf32>
    %139 = arith.addf %114, %138 : vector<16x64xf32>
    %140 = arith.addf %3, %139 : vector<16x64xf32>
    %c0_49 = arith.constant 0 : index
    %c0_50 = arith.constant 0 : index
    %c0_51 = arith.constant 0 : index
    %141 = vector.load %arg11[%c0_49, %c0_50, %c0_51] : memref<1x1x64xf32, #tpu.memory_space<vmem>>, vector<1x1x64xf32>
    %142 = vector.shape_cast %141 : vector<1x1x64xf32> to vector<1x64xf32>
    %143 = vector.broadcast %142 : vector<1x64xf32> to vector<16x64xf32>
    %144 = arith.addf %140, %143 : vector<16x64xf32>
    %c0_52 = arith.constant 0 : index
    %c0_53 = arith.constant 0 : index
    %c0_54 = arith.constant 0 : index
    %145 = vector.load %arg12[%c0_52, %c0_53, %c0_54] : memref<1x1x64xf32, #tpu.memory_space<vmem>>, vector<1x1x64xf32>
    %146 = vector.shape_cast %145 : vector<1x1x64xf32> to vector<1x64xf32>
    %c0_55 = arith.constant 0 : index
    %c0_56 = arith.constant 0 : index
    %c0_57 = arith.constant 0 : index
    %147 = vector.load %arg13[%c0_55, %c0_56, %c0_57] : memref<1x1x64xf32, #tpu.memory_space<vmem>>, vector<1x1x64xf32>
    %148 = vector.shape_cast %147 : vector<1x1x64xf32> to vector<1x64xf32>
    %cst_58 = arith.constant dense<0.000000e+00> : vector<16xf32>
    %149 = vector.multi_reduction <add>, %144, %cst_58 [1] : vector<16x64xf32> to vector<16xf32>
    %150 = vector.shape_cast %149 : vector<16xf32> to vector<16x1xf32>
    %cst_59 = arith.constant 6.400000e+01 : f32
    %151 = vector.broadcast %cst_59 : f32 to vector<16x1xf32>
    %152 = arith.divf %150, %151 : vector<16x1xf32>
    %153 = vector.broadcast %152 : vector<16x1xf32> to vector<16x64xf32>
    %154 = arith.subf %144, %153 : vector<16x64xf32>
    %155 = arith.mulf %154, %154 : vector<16x64xf32>
    %cst_60 = arith.constant dense<0.000000e+00> : vector<16xf32>
    %156 = vector.multi_reduction <add>, %155, %cst_60 [1] : vector<16x64xf32> to vector<16xf32>
    %157 = vector.shape_cast %156 : vector<16xf32> to vector<16x1xf32>
    %cst_61 = arith.constant 6.400000e+01 : f32
    %158 = vector.broadcast %cst_61 : f32 to vector<16x1xf32>
    %159 = arith.divf %157, %158 : vector<16x1xf32>
    %cst_62 = arith.constant 9.99999997E-7 : f32
    %160 = vector.broadcast %cst_62 : f32 to vector<16x1xf32>
    %161 = arith.addf %159, %160 : vector<16x1xf32>
    %162 = math.rsqrt %161 : vector<16x1xf32>
    %163 = vector.broadcast %162 : vector<16x1xf32> to vector<16x64xf32>
    %164 = arith.mulf %154, %163 : vector<16x64xf32>
    %165 = vector.broadcast %146 : vector<1x64xf32> to vector<16x64xf32>
    %166 = arith.mulf %164, %165 : vector<16x64xf32>
    %167 = vector.broadcast %148 : vector<1x64xf32> to vector<16x64xf32>
    %168 = arith.addf %166, %167 : vector<16x64xf32>
    %169 = arith.truncf %168 : vector<16x64xf32> to vector<16x64xbf16>
    %c0_63 = arith.constant 0 : index
    %c0_64 = arith.constant 0 : index
    %c0_65 = arith.constant 0 : index
    %170 = vector.load %arg14[%c0_63, %c0_64, %c0_65] : memref<1x64x256xbf16, #tpu.memory_space<vmem>>, vector<1x64x256xbf16>
    %171 = vector.shape_cast %170 : vector<1x64x256xbf16> to vector<64x256xbf16>
    %cst_66 = arith.constant dense<0.000000e+00> : vector<16x256xf32>
    %172 = tpu.matmul %169, %171, %cst_66 {dimension_numbers = #tpu.dot_dimension_numbers<[1], [0], [0], [1], [0, 0, 1, 1], [], []>} : vector<16x64xbf16>, vector<64x256xbf16>, vector<16x256xf32> -> vector<16x256xf32>
    %c0_67 = arith.constant 0 : index
    %c0_68 = arith.constant 0 : index
    %c0_69 = arith.constant 0 : index
    %173 = vector.load %arg15[%c0_67, %c0_68, %c0_69] : memref<1x1x256xf32, #tpu.memory_space<vmem>>, vector<1x1x256xf32>
    %174 = vector.shape_cast %173 : vector<1x1x256xf32> to vector<1x256xf32>
    %175 = vector.broadcast %174 : vector<1x256xf32> to vector<16x256xf32>
    %176 = arith.addf %172, %175 : vector<16x256xf32>
    %cst_70 = arith.constant 5.000000e-01 : f32
    %177 = vector.broadcast %cst_70 : f32 to vector<16x256xf32>
    %178 = arith.mulf %177, %176 : vector<16x256xf32>
    %cst_71 = arith.constant 0.707106769 : f32
    %179 = vector.broadcast %cst_71 : f32 to vector<16x256xf32>
    %180 = arith.mulf %176, %179 : vector<16x256xf32>
    %181 = math.absf %180 : vector<16x256xf32>
    %cst_72 = arith.constant 0.327591091 : f32
    %182 = vector.broadcast %cst_72 : f32 to vector<16x256xf32>
    %183 = arith.mulf %182, %181 : vector<16x256xf32>
    %cst_73 = arith.constant 1.000000e+00 : f32
    %184 = vector.broadcast %cst_73 : f32 to vector<16x256xf32>
    %185 = arith.addf %184, %183 : vector<16x256xf32>
    %cst_74 = arith.constant 1.000000e+00 : f32
    %186 = vector.broadcast %cst_74 : f32 to vector<16x256xf32>
    %187 = arith.divf %186, %185 : vector<16x256xf32>
    %cst_75 = arith.constant 1.06140542 : f32
    %188 = vector.broadcast %cst_75 : f32 to vector<16x256xf32>
    %189 = arith.mulf %188, %187 : vector<16x256xf32>
    %cst_76 = arith.constant -1.45315206 : f32
    %190 = vector.broadcast %cst_76 : f32 to vector<16x256xf32>
    %191 = arith.addf %189, %190 : vector<16x256xf32>
    %192 = arith.mulf %191, %187 : vector<16x256xf32>
    %cst_77 = arith.constant 1.42141378 : f32
    %193 = vector.broadcast %cst_77 : f32 to vector<16x256xf32>
    %194 = arith.addf %192, %193 : vector<16x256xf32>
    %195 = arith.mulf %194, %187 : vector<16x256xf32>
    %cst_78 = arith.constant -0.284496725 : f32
    %196 = vector.broadcast %cst_78 : f32 to vector<16x256xf32>
    %197 = arith.addf %195, %196 : vector<16x256xf32>
    %198 = arith.mulf %197, %187 : vector<16x256xf32>
    %cst_79 = arith.constant 0.254829586 : f32
    %199 = vector.broadcast %cst_79 : f32 to vector<16x256xf32>
    %200 = arith.addf %198, %199 : vector<16x256xf32>
    %201 = arith.mulf %200, %187 : vector<16x256xf32>
    %cst_80 = arith.constant 0.000000e+00 : f32
    %202 = vector.broadcast %cst_80 : f32 to vector<16x256xf32>
    %203 = arith.subf %202, %181 : vector<16x256xf32>
    %204 = arith.mulf %203, %181 : vector<16x256xf32>
    %205 = math.exp %204 : vector<16x256xf32>
    %206 = arith.mulf %201, %205 : vector<16x256xf32>
    %cst_81 = arith.constant 1.000000e+00 : f32
    %207 = vector.broadcast %cst_81 : f32 to vector<16x256xf32>
    %208 = arith.subf %207, %206 : vector<16x256xf32>
    %cst_82 = arith.constant 0.000000e+00 : f32
    %209 = vector.broadcast %cst_82 : f32 to vector<16x256xf32>
    %210 = arith.cmpf olt, %180, %209 : vector<16x256xf32>
    %cst_83 = arith.constant 0.000000e+00 : f32
    %211 = vector.broadcast %cst_83 : f32 to vector<16x256xf32>
    %212 = arith.subf %211, %208 : vector<16x256xf32>
    %213 = arith.select %210, %212, %208 : vector<16x256xi1>, vector<16x256xf32>
    %cst_84 = arith.constant 1.000000e+00 : f32
    %214 = vector.broadcast %cst_84 : f32 to vector<16x256xf32>
    %215 = arith.addf %214, %213 : vector<16x256xf32>
    %216 = arith.mulf %178, %215 : vector<16x256xf32>
    %217 = arith.truncf %216 : vector<16x256xf32> to vector<16x256xbf16>
    %c0_85 = arith.constant 0 : index
    %c0_86 = arith.constant 0 : index
    %c0_87 = arith.constant 0 : index
    %218 = vector.load %arg16[%c0_85, %c0_86, %c0_87] : memref<1x256x64xbf16, #tpu.memory_space<vmem>>, vector<1x256x64xbf16>
    %219 = vector.shape_cast %218 : vector<1x256x64xbf16> to vector<256x64xbf16>
    %cst_88 = arith.constant dense<0.000000e+00> : vector<16x64xf32>
    %220 = tpu.matmul %217, %219, %cst_88 {dimension_numbers = #tpu.dot_dimension_numbers<[1], [0], [0], [1], [0, 0, 1, 1], [], []>} : vector<16x256xbf16>, vector<256x64xbf16>, vector<16x64xf32> -> vector<16x64xf32>
    %221 = arith.addf %144, %220 : vector<16x64xf32>
    %c0_89 = arith.constant 0 : index
    %c0_90 = arith.constant 0 : index
    %c0_91 = arith.constant 0 : index
    %222 = vector.load %arg17[%c0_89, %c0_90, %c0_91] : memref<1x1x64xf32, #tpu.memory_space<vmem>>, vector<1x1x64xf32>
    %223 = vector.shape_cast %222 : vector<1x1x64xf32> to vector<1x64xf32>
    %224 = vector.broadcast %223 : vector<1x64xf32> to vector<16x64xf32>
    %225 = arith.addf %221, %224 : vector<16x64xf32>
    %c0_92 = arith.constant 0 : index
    %c0_93 = arith.constant 0 : index
    %226 = vector.load %arg23[%c0_92, %c0_93] : memref<16x64xf32, #tpu.memory_space<vmem>>, vector<16x64xf32>
    tpu.vector_store %arg23[%c0_92, %c0_93], %225 {strides = array<i32>} : memref<16x64xf32, #tpu.memory_space<vmem>>, vector<16x64xf32>,
    %c1_i32 = arith.constant 1 : i32
    %227 = arith.cmpi eq, %arg1, %c1_i32 : i32
    %228 = arith.extui %227 : i1 to i32
    %c0_i32_94 = arith.constant 0 : i32
    %229 = arith.cmpi ne, %228, %c0_i32_94 : i32
    scf.if %229 {
      %c0_95 = arith.constant 0 : index
      %c0_96 = arith.constant 0 : index
      %230 = vector.load %arg18[%c0_95, %c0_96] : memref<1x64xf32, #tpu.memory_space<vmem>>, vector<1x64xf32>
      %c0_97 = arith.constant 0 : index
      %c0_98 = arith.constant 0 : index
      %231 = vector.load %arg19[%c0_97, %c0_98] : memref<1x64xf32, #tpu.memory_space<vmem>>, vector<1x64xf32>
      %cst_99 = arith.constant dense<0.000000e+00> : vector<16xf32>
      %232 = vector.multi_reduction <add>, %225, %cst_99 [1] : vector<16x64xf32> to vector<16xf32>
      %233 = vector.shape_cast %232 : vector<16xf32> to vector<16x1xf32>
      %cst_100 = arith.constant 6.400000e+01 : f32
      %234 = vector.broadcast %cst_100 : f32 to vector<16x1xf32>
      %235 = arith.divf %233, %234 : vector<16x1xf32>
      %236 = vector.broadcast %235 : vector<16x1xf32> to vector<16x64xf32>
      %237 = arith.subf %225, %236 : vector<16x64xf32>
      %238 = arith.mulf %237, %237 : vector<16x64xf32>
      %cst_101 = arith.constant dense<0.000000e+00> : vector<16xf32>
      %239 = vector.multi_reduction <add>, %238, %cst_101 [1] : vector<16x64xf32> to vector<16xf32>
      %240 = vector.shape_cast %239 : vector<16xf32> to vector<16x1xf32>
      %cst_102 = arith.constant 6.400000e+01 : f32
      %241 = vector.broadcast %cst_102 : f32 to vector<16x1xf32>
      %242 = arith.divf %240, %241 : vector<16x1xf32>
      %cst_103 = arith.constant 9.99999997E-7 : f32
      %243 = vector.broadcast %cst_103 : f32 to vector<16x1xf32>
      %244 = arith.addf %242, %243 : vector<16x1xf32>
      %245 = math.rsqrt %244 : vector<16x1xf32>
      %246 = vector.broadcast %245 : vector<16x1xf32> to vector<16x64xf32>
      %247 = arith.mulf %237, %246 : vector<16x64xf32>
      %248 = vector.broadcast %230 : vector<1x64xf32> to vector<16x64xf32>
      %249 = arith.mulf %247, %248 : vector<16x64xf32>
      %250 = vector.broadcast %231 : vector<1x64xf32> to vector<16x64xf32>
      %251 = arith.addf %249, %250 : vector<16x64xf32>
      %252 = arith.truncf %251 : vector<16x64xf32> to vector<16x64xbf16>
      %c0_104 = arith.constant 0 : index
      %c0_105 = arith.constant 0 : index
      %253 = vector.load %arg20[%c0_104, %c0_105] : memref<64x32xbf16, #tpu.memory_space<vmem>>, vector<64x32xbf16>
      %cst_106 = arith.constant dense<0.000000e+00> : vector<16x32xf32>
      %254 = tpu.matmul %252, %253, %cst_106 {dimension_numbers = #tpu.dot_dimension_numbers<[1], [0], [0], [1], [0, 0, 1, 1], [], []>} : vector<16x64xbf16>, vector<64x32xbf16>, vector<16x32xf32> -> vector<16x32xf32>
      %c0_107 = arith.constant 0 : index
      %c0_108 = arith.constant 0 : index
      %255 = vector.load %arg21[%c0_107, %c0_108] : memref<1x32xf32, #tpu.memory_space<vmem>>, vector<1x32xf32>
      %256 = vector.broadcast %255 : vector<1x32xf32> to vector<16x32xf32>
      %257 = arith.addf %254, %256 : vector<16x32xf32>
      %258 = vector.extract_strided_slice %257 {offsets = [0, 0], sizes = [4, 32], strides = [1, 1]} : vector<16x32xf32> to vector<4x32xf32>
      %c0_109 = arith.constant 0 : index
      %c0_110 = arith.constant 0 : index
      %c0_111 = arith.constant 0 : index
      %259 = vector.load %arg22[%c0_109, %c0_110, %c0_111] : memref<2x4x32xf32, #tpu.memory_space<vmem>>, vector<1x4x32xf32>
      %260 = vector.shape_cast %259 : vector<1x4x32xf32> to vector<4x32xf32>
      %261 = vector.shape_cast %258 : vector<4x32xf32> to vector<1x4x32xf32>
      tpu.vector_store %arg22[%c0_109, %c0_110, %c0_111], %261 {strides = array<i32>} : memref<2x4x32xf32, #tpu.memory_space<vmem>>, vector<1x4x32xf32>,
      %262 = vector.extract_strided_slice %257 {offsets = [8, 0], sizes = [4, 32], strides = [1, 1]} : vector<16x32xf32> to vector<4x32xf32>
      %c1 = arith.constant 1 : index
      %c0_112 = arith.constant 0 : index
      %c0_113 = arith.constant 0 : index
      %263 = vector.load %arg22[%c1, %c0_112, %c0_113] : memref<2x4x32xf32, #tpu.memory_space<vmem>>, vector<1x4x32xf32>
      %264 = vector.shape_cast %263 : vector<1x4x32xf32> to vector<4x32xf32>
      %265 = vector.shape_cast %262 : vector<4x32xf32> to vector<1x4x32xf32>
      tpu.vector_store %arg22[%c1, %c0_112, %c0_113], %265 {strides = array<i32>} : memref<2x4x32xf32, #tpu.memory_space<vmem>>, vector<1x4x32xf32>,
    } else {
    }
    return
  }
  func.func @transform_0(%arg0: i32, %arg1: i32) -> (i32, i32, i32) {
    %c0_i32 = arith.constant 0 : i32
    %c0_i32_0 = arith.constant 0 : i32
    %c0_i32_1 = arith.constant 0 : i32
    return %arg0, %c0_i32, %c0_i32_0 : i32, i32, i32
  }
  func.func @transform_1(%arg0: i32, %arg1: i32) -> (i32, i32) {
    %c0_i32 = arith.constant 0 : i32
    %c0_i32_0 = arith.constant 0 : i32
    %c0_i32_1 = arith.constant 0 : i32
    return %c0_i32, %c0_i32_0 : i32, i32
  }
  func.func @transform_2(%arg0: i32, %arg1: i32) -> (i32, i32) {
    %c0_i32 = arith.constant 0 : i32
    %c0_i32_0 = arith.constant 0 : i32
    %c0_i32_1 = arith.constant 0 : i32
    return %c0_i32, %c0_i32_0 : i32, i32
  }
  func.func @transform_3(%arg0: i32, %arg1: i32) -> (i32, i32) {
    %c0_i32 = arith.constant 0 : i32
    %c0_i32_0 = arith.constant 0 : i32
    %c0_i32_1 = arith.constant 0 : i32
    return %c0_i32, %c0_i32_0 : i32, i32
  }
  func.func @transform_4(%arg0: i32, %arg1: i32) -> (i32, i32, i32) {
    %c0_i32 = arith.constant 0 : i32
    %c0_i32_0 = arith.constant 0 : i32
    %c0_i32_1 = arith.constant 0 : i32
    return %arg1, %c0_i32, %c0_i32_0 : i32, i32, i32
  }
  func.func @transform_5(%arg0: i32, %arg1: i32) -> (i32, i32, i32) {
    %c0_i32 = arith.constant 0 : i32
    %c0_i32_0 = arith.constant 0 : i32
    %c0_i32_1 = arith.constant 0 : i32
    return %arg1, %c0_i32, %c0_i32_0 : i32, i32, i32
  }
  func.func @transform_6(%arg0: i32, %arg1: i32) -> (i32, i32, i32) {
    %c0_i32 = arith.constant 0 : i32
    %c0_i32_0 = arith.constant 0 : i32
    %c0_i32_1 = arith.constant 0 : i32
    return %arg1, %c0_i32, %c0_i32_0 : i32, i32, i32
  }
  func.func @transform_7(%arg0: i32, %arg1: i32) -> (i32, i32, i32) {
    %c0_i32 = arith.constant 0 : i32
    %c0_i32_0 = arith.constant 0 : i32
    %c0_i32_1 = arith.constant 0 : i32
    return %arg1, %c0_i32, %c0_i32_0 : i32, i32, i32
  }
  func.func @transform_8(%arg0: i32, %arg1: i32) -> (i32, i32, i32) {
    %c0_i32 = arith.constant 0 : i32
    %c0_i32_0 = arith.constant 0 : i32
    %c0_i32_1 = arith.constant 0 : i32
    return %arg1, %c0_i32, %c0_i32_0 : i32, i32, i32
  }
  func.func @transform_9(%arg0: i32, %arg1: i32) -> (i32, i32, i32) {
    %c0_i32 = arith.constant 0 : i32
    %c0_i32_0 = arith.constant 0 : i32
    %c0_i32_1 = arith.constant 0 : i32
    return %arg1, %c0_i32, %c0_i32_0 : i32, i32, i32
  }
  func.func @transform_10(%arg0: i32, %arg1: i32) -> (i32, i32, i32) {
    %c0_i32 = arith.constant 0 : i32
    %c0_i32_0 = arith.constant 0 : i32
    %c0_i32_1 = arith.constant 0 : i32
    return %arg1, %c0_i32, %c0_i32_0 : i32, i32, i32
  }
  func.func @transform_11(%arg0: i32, %arg1: i32) -> (i32, i32, i32) {
    %c0_i32 = arith.constant 0 : i32
    %c0_i32_0 = arith.constant 0 : i32
    %c0_i32_1 = arith.constant 0 : i32
    return %arg1, %c0_i32, %c0_i32_0 : i32, i32, i32
  }
  func.func @transform_12(%arg0: i32, %arg1: i32) -> (i32, i32, i32) {
    %c0_i32 = arith.constant 0 : i32
    %c0_i32_0 = arith.constant 0 : i32
    %c0_i32_1 = arith.constant 0 : i32
    return %arg1, %c0_i32, %c0_i32_0 : i32, i32, i32
  }
  func.func @transform_13(%arg0: i32, %arg1: i32) -> (i32, i32, i32) {
    %c0_i32 = arith.constant 0 : i32
    %c0_i32_0 = arith.constant 0 : i32
    %c0_i32_1 = arith.constant 0 : i32
    return %arg1, %c0_i32, %c0_i32_0 : i32, i32, i32
  }
  func.func @transform_14(%arg0: i32, %arg1: i32) -> (i32, i32, i32) {
    %c0_i32 = arith.constant 0 : i32
    %c0_i32_0 = arith.constant 0 : i32
    %c0_i32_1 = arith.constant 0 : i32
    return %arg1, %c0_i32, %c0_i32_0 : i32, i32, i32
  }
  func.func @transform_15(%arg0: i32, %arg1: i32) -> (i32, i32, i32) {
    %c0_i32 = arith.constant 0 : i32
    %c0_i32_0 = arith.constant 0 : i32
    %c0_i32_1 = arith.constant 0 : i32
    return %arg1, %c0_i32, %c0_i32_0 : i32, i32, i32
  }
  func.func @transform_16(%arg0: i32, %arg1: i32) -> (i32, i32) {
    %c0_i32 = arith.constant 0 : i32
    %c0_i32_0 = arith.constant 0 : i32
    %c0_i32_1 = arith.constant 0 : i32
    return %c0_i32, %c0_i32_0 : i32, i32
  }
  func.func @transform_17(%arg0: i32, %arg1: i32) -> (i32, i32) {
    %c0_i32 = arith.constant 0 : i32
    %c0_i32_0 = arith.constant 0 : i32
    %c0_i32_1 = arith.constant 0 : i32
    return %c0_i32, %c0_i32_0 : i32, i32
  }
  func.func @transform_18(%arg0: i32, %arg1: i32) -> (i32, i32) {
    %c0_i32 = arith.constant 0 : i32
    %c0_i32_0 = arith.constant 0 : i32
    %c0_i32_1 = arith.constant 0 : i32
    return %c0_i32, %c0_i32_0 : i32, i32
  }
  func.func @transform_19(%arg0: i32, %arg1: i32) -> (i32, i32) {
    %c0_i32 = arith.constant 0 : i32
    %c0_i32_0 = arith.constant 0 : i32
    %c0_i32_1 = arith.constant 0 : i32
    return %c0_i32, %c0_i32_0 : i32, i32
  }
  func.func @transform_20(%arg0: i32, %arg1: i32) -> (i32, i32, i32) {
    %c0_i32 = arith.constant 0 : i32
    %c0_i32_0 = arith.constant 0 : i32
    %c0_i32_1 = arith.constant 0 : i32
    return %arg0, %c0_i32, %c0_i32_0 : i32, i32, i32
  }
}

</mosaic_0001>

<bundles_post_ra>
// kernel: overhead_encoder.1
= control target key start
LH: loop header
LB: loop body
LE: loop exit
PB: predicated region body
PF: predicated region fallthrough
CT: control target
= control target key end

     0   :  { %s4442_s0 = inlined_call_operand.vmem [shape: bf16[2,16,768], index: 0, kind: input, shape index: {}]   ;;  %s4443_s1 = inlined_call_operand.vmem [shape: f32[16,64], index: 1, kind: input, shape index: {}]   ;;  %s4444_s2 = inlined_call_operand.vmem [shape: f32[16,16], index: 2, kind: input, shape index: {}]   ;;  %s4445_s3 = inlined_call_operand.vmem [shape: bf16[768,64], index: 3, kind: input, shape index: {}]   ;;  %s4446_s4 = inlined_call_operand.vmem [shape: f32[2,1,64], index: 4, kind: input, shape index: {}]   ;;  %s4447_s5 = inlined_call_operand.vmem [shape: f32[2,1,64], index: 5, kind: input, shape index: {}]   ;;  %s4448_s6 = inlined_call_operand.vmem [shape: bf16[2,64,192], index: 6, kind: input, shape index: {}]   ;;  %s4449_s7 = inlined_call_operand.vmem [shape: f32[2,1,192], index: 7, kind: input, shape index: {}]   ;;  %s4450_s8 = inlined_call_operand.vmem [shape: bf16[2,64,64], index: 8, kind: input, shape index: {}]   ;;  %s4451_s9 = inlined_call_operand.vmem [shape: f32[2,1,64], index: 9, kind: input, shape index: {}]   ;;  %s4452_s10 = inlined_call_operand.vmem [shape: f32[2,1,64], index: 10, kind: input, shape index: {}]   ;;  %s4453_s11 = inlined_call_operand.vmem [shape: f32[2,1,64], index: 11, kind: input, shape index: {}]   ;;  %s4454_s12 = inlined_call_operand.vmem [shape: bf16[2,64,256], index: 12, kind: input, shape index: {}]   ;;  %s4455_s13 = inlined_call_operand.vmem [shape: f32[2,1,256], index: 13, kind: input, shape index: {}]   ;;  %s4456_s14 = inlined_call_operand.vmem [shape: bf16[2,256,64], index: 14, kind: input, shape index: {}]   ;;  %s4457_s15 = inlined_call_operand.vmem [shape: f32[2,1,64], index: 15, kind: input, shape index: {}]   ;;  %s4458_s16 = inlined_call_operand.vmem [shape: f32[1,64], index: 16, kind: input, shape index: {}]   ;;  %s4459_s17 = inlined_call_operand.vmem [shape: f32[1,64], index: 17, kind: input, shape index: {}]   ;;  %s4460_s18 = inlined_call_operand.vmem [shape: bf16[64,32], index: 18, kind: input, shape index: {}]   ;;  %s4461_s19 = inlined_call_operand.vmem [shape: f32[1,32], index: 19, kind: input, shape index: {}]   ;;  %s4462_s20 = inlined_call_operand.hbm [shape: f32[4,4,32], index: 20, kind: output, shape index: {}]  }
   0x1   :  { %4482 = sst [smem:[#allocation19_spill]] %s4442_s0 }
   0x2   :  { %4483 = sst [smem:[#allocation20_spill]] %s4443_s1 }
   0x3   :  { %4484 = sst [smem:[#allocation21_spill]] %s4444_s2 }
   0x4   :  { %4485 = sst [smem:[#allocation22_spill]] %s4445_s3 }
   0x5   :  { %4486 = sst [smem:[#allocation23_spill]] %s4446_s4 }
   0x6   :  { %4487 = sst [smem:[#allocation24_spill]] %s4447_s5 }
   0x7   :  { %4488 = sst [smem:[#allocation25_spill]] %s4448_s6 }
   0x8   :  { %4489 = sst [smem:[#allocation26_spill]] %s4449_s7 }
   0x9   :  { %4490 = sst [smem:[#allocation27_spill]] %s4458_s16 }
   0xa   :  { %4491 = sst [smem:[#allocation28_spill]] %s4459_s17 }
   0xb   :  { %4492 = sst [smem:[#allocation29_spill]] %s4460_s18 }
   0xc   :  { %4493 = sst [smem:[#allocation30_spill]] %s4461_s19 }
   0xd   :  { %4494 = sst [smem:[#allocation31_spill]] %s4462_s20 }
   0xe   :  { %25 = vsyncpa [#allocation4], 0 }
   0xf   :  { %27 = vsyncpa [#allocation4 + $0x1], 0  ;;  %s3693_s1 = smov 0   ;;  %s3695_s22 = smov 0  }
  0x10   :  { %s3697_s23 = smov 0   ;;  %s3699_s24 = smov 0  }
  0x11   :  { %s3701_s2 = smov 0   ;;  %s3703_s25 = smov 0  }
  0x12   :  { %s3705_s3 = smov 0   ;;  %s3707_s26 = smov 0  }
  0x13 LB: > { %4495 = sst [smem:[#allocation6_spill]] %s3549_s1  ;;  %s2814_s27 = sadd.s32 4294967295, %s3577_s26   ;;  %s3577_s26 = sphi %s3707_s26, %s33_s26   ;;  %s3573_s3 = sphi %s3705_s3, %s4554_s3   ;;  %s3569_s25 = sphi %s3703_s25, %s4553_s25   ;;  %s3565_s2 = sphi %s3701_s2, %s4552_s2   ;;  %s3561_s24 = sphi %s3699_s24, %s4551_s24   ;;  %s3557_s23 = sphi %s3697_s23, %s4550_s23   ;;  %s3553_s22 = sphi %s3695_s22, %s4549_s22   ;;  %s3549_s1 = sphi %s3693_s1, %s4548_s1  }
  0x14   : > { %4496 = sst [smem:[#allocation7_spill]] %s3553_s22  ;;  %s2815_s28 = sadd.s32 4294967294, %s3577_s26  }
  0x15   : > { %4497 = sst [smem:[#allocation8_spill]] %s3557_s23  ;;  %s42_s4 = sadd.s32 1, %s3569_s25 }
  0x16   : > { %4498 = sst [smem:[#allocation9_spill]] %s3561_s24  ;;  %p43_p0 = scmp.ge.s32.totalorder %s42_s4, 2 }
  0x17   : > { %4499 = sst [smem:[#allocation10_spill]] %s3565_s2  ;;  %s45_s29 = sadd.s32 1, %s3573_s3 }
  0x18   : > { %4500 = sst [smem:[#allocation11_spill]] %s3569_s25  ;;  %p547_p1 = scmp.ne.s32.totalorder %s3557_s23, %s3553_s22 }
  0x19   : > { %4501 = sst [smem:[#allocation12_spill]] %s3573_s3  ;;  %p548_p2 = scmp.eq.s32.totalorder %s2814_s27, 3 }
  0x1a   : > { %4502 = sst [smem:[#allocation13_spill]] %s3577_s26  ;;  %s4556_s4 = smov (%p43_p0, %s42_s4), 0 }
  0x1b   : > { %4503 = sst [smem:[#allocation14_spill]] %s4556_s4  ;;  %s4558_s29 = smov (!%p43_p0, %s45_s29), %s3573_s3 }
  0x1c   : > { %p3742_p3 = por %p548_p2, %p547_p1  ;;  %p553_p4 = scmp.ne.s32.totalorder %s3553_s22, %s3549_s1 }
  0x1d   : > { %p47_p5 = scmp.ge.s32.totalorder %s4558_s29, 2  ;;  %p554_p6 = scmp.eq.s32.totalorder %s2815_s28, 3 }
  0x1e   : > { %s4504_s30 = scalar_select %p3742_p3, 1, 0 }
  0x1f   : > { %p2818_p7 = scmp.ge.s32.totalorder %s3577_s26, 1  ;;  %p683_p8 = scmp.lt.s32.totalorder %s3577_s26, 5 }
  0x20   : > { %4505 = sst [smem:[#allocation15_spill]] %s4504_s30  ;;  %s4560_s29 = smov (%p47_p5, %s4558_s29), 0 }
  0x21   : > { %4506 = sst [smem:[#allocation16_spill]] %s4560_s29  ;;  %p3752_p9 = por %p554_p6, %p553_p4 }
  0x22   : > { %p684_p10 = pnand %p2818_p7, %p683_p8  ;;  %s534_s21 = ssub.s32 %s3573_s3, %s4560_s29 }
  0x23   : > { %s4507_s0 = scalar_select %p3752_p9, 1, 0 }
  0x24   : > { %s537_s27 = sadd.s32 1, %s3557_s23  ;;  %p535_p11 = scmp.eq.s32.totalorder %s534_s21, 0 }
  0x25   : > { %4508 = sst [smem:[#allocation17_spill]] %s4507_s0  ;;  %687 = sbr.rel (%p684_p10) target bundleno = 3096 (0xc18), region = 100 }
  0x26   : > { %s3760_s4 = scalar_select %p535_p11, %s3557_s23, %s537_s27  }
  0x27   : > { %s4471_s28 = sand.u32 (!%p684_p10), 1, %s3553_s22   ;;  %p787_p12 = scmp.lt.s32.totalorder (!%p684_p10), %s3565_s2, 1 }
  0x28   : > { %4509 = sst [smem:[#allocation18_spill]] %s3760_s4  ;;  %s2819_s25 = sshll.u32 (!%p684_p10), %s4471_s28, 3 }
  0x29   : > { %p792_p13 = scmp.lt.s32.totalorder (!%p684_p10), %s3561_s24, 1  ;;  %s4512_s22 = sld [smem:[#allocation19_spill]] (!%p684_p10) }
  0x2a   : > { %s788_s1 = scalar_select %p787_p12, %s3565_s2, 1 }
  0x2b   : > { %s3769_s0 = scalar_select %p792_p13, %s3561_s24, 1 }
  0x2c   : > { %s3331_s21 = smul.u32 48, %s788_s1  ;;  %s4513_s6 = sld [smem:[#allocation25_spill]] }
  0x2d   : > { %s3232_s19 = sshll.u32 %s3769_s0, 6  ;;  %s2823_s1 = sshll.u32 %s3769_s0, 1 }
  0x2e   : > { %s4514_s7 = sld [smem:[#allocation26_spill]]  ;;  %s3233_s27 = sshll.u32 %s3769_s0, 5 }
  0x2f   : > { %s3782_s2 = scalar_lea.vmem %s4512_s22, %s3331_s21  ;;  %s3800_s26 = scalar_lea.vmem %s4450_s8, %s3233_s27 }
  0x30   : > { %s3817_s5 = scalar_lea.vmem %s4454_s12, %s3232_s19  ;;  %s3822_s28 = scalar_lea.vmem %s4455_s13, %s2823_s1 }
  0x31   : > { %s3235_s20 = sshll.u32 %s3769_s0, 7  ;;  %s837_s21 = scalar_lea.vmem %s4457_s15, %s3769_s0 }
  0x32   : > { %s3788_s18 = scalar_lea.vmem %s4513_s6, %s3232_s19  ;;  %s3832_s6 = scalar_lea.vmem %s4456_s14, %s3235_s20 }
  0x33   : > { %s3834_s4 = scalar_lea.vmem [#allocation3], %s2819_s25 }
  0x34   : > { %s3794_s3 = scalar_lea.vmem %s4514_s7, %s2823_s1  ;;  %s4515_s7 = sld [smem:[#allocation9_spill]] }
  0x3a   : > { %p2831_p0 = scmp.ne.s32.totalorder %s4515_s7, 0 }
  0x3b   : > { %s4516_s23 = sld [smem:[#allocation22_spill]] (!%p2831_p0) }
  0x3c   : > { %843 = sbr.rel (%p2831_p0) target bundleno = 268 (0x10c), region = 104 }
  0x41   : > { %s4517_s27 = smov %s4516_s23  ;;  %v3249_v0 = vld [vmem:[%s4516_s23 + $0x38] sm:$0xff]  ;;  %v2834_v30 = vld [vmem:[%s3782_s2] sm:$0xf]  ;;  %v3236_v32 = vld [vmem:[%s3782_s2 + $0x4] sm:$0xf]  ;;  %s4518_s23 = sld [smem:[#allocation20_spill]] }
  0x42   : > { %v3257_v1 = vld [vmem:[%s4517_s27 + $0x78] sm:$0xff]  ;;  %1266 = vmatpush.bf16.msra.mxu0 %v3249_v0  ;;  %v3248_v4 = vld [vmem:[%s4517_s27 + $0x30] sm:$0xff]  ;;  %v3247_v8 = vld [vmem:[%s4517_s27 + $0x28] sm:$0xff]  ;;  %vm1350_vm0 = vcmask 523264  }
  0x43   : > { %v3265_v2 = vld [vmem:[%s4517_s27 + $0xb8] sm:$0xff]  ;;  %1280 = vmatpush.bf16.msra.mxu1 %v3257_v1  ;;  %v3256_v5 = vld [vmem:[%s4517_s27 + $0x70] sm:$0xff]  ;;  %v3255_v9 = vld [vmem:[%s4517_s27 + $0x68] sm:$0xff] }
  0x44   : > { %v3273_v3 = vld [vmem:[%s4517_s27 + $0xf8] sm:$0xff]  ;;  %1294 = vmatpush.bf16.msra.mxu2 %v3265_v2  ;;  %v3264_v6 = vld [vmem:[%s4517_s27 + $0xb0] sm:$0xff]  ;;  %v3263_v10 = vld [vmem:[%s4517_s27 + $0xa8] sm:$0xff] }
  0x45   : > { %1308 = vmatpush.bf16.msra.mxu3 %v3273_v3  ;;  %v3272_v7 = vld [vmem:[%s4517_s27 + $0xf0] sm:$0xff]  ;;  %v3271_v11 = vld [vmem:[%s4517_s27 + $0xe8] sm:$0xff]  ;;  %v3246_v12 = vld [vmem:[%s4517_s27 + $0x20] sm:$0xff] }
  0x46   : > { %1267 = vmatpush.bf16.msra.mxu0 %v3248_v4  ;;  %v3254_v13 = vld [vmem:[%s4517_s27 + $0x60] sm:$0xff]  ;;  %v3245_v16 = vld [vmem:[%s4517_s27 + $0x18] sm:$0xff]  ;;  %v3244_v20 = vld [vmem:[%s4517_s27 + $0x10] sm:$0xff] }
  0x47   : > { %1281 = vmatpush.bf16.msra.mxu1 %v3256_v5  ;;  %v3262_v14 = vld [vmem:[%s4517_s27 + $0xa0] sm:$0xff]  ;;  %v3253_v17 = vld [vmem:[%s4517_s27 + $0x58] sm:$0xff]  ;;  %v3252_v21 = vld [vmem:[%s4517_s27 + $0x50] sm:$0xff]  ;;  %s4519_s30 = smov %s4518_s23 }
  0x48   : > { %1295 = vmatpush.bf16.msra.mxu2 %v3264_v6  ;;  %v3270_v15 = vld [vmem:[%s4517_s27 + $0xe0] sm:$0xff]  ;;  %v3261_v18 = vld [vmem:[%s4517_s27 + $0x98] sm:$0xff]  ;;  %v3260_v22 = vld [vmem:[%s4517_s27 + $0x90] sm:$0xff] }
  0x49   : > { %1309 = vmatpush.bf16.msra.mxu3 %v3272_v7  ;;  %v3269_v19 = vld [vmem:[%s4517_s27 + $0xd8] sm:$0xff]  ;;  %v3268_v23 = vld [vmem:[%s4517_s27 + $0xd0] sm:$0xff]  ;;  %v3243_v24 = vld [vmem:[%s4517_s27 + $0x8] sm:$0xff] }
  0x4a   : > { %1268 = vmatpush.bf16.msra.mxu0 %v3247_v8  ;;  %v3251_v25 = vld [vmem:[%s4517_s27 + $0x48] sm:$0xff]  ;;  %v3242_v28 = vld [vmem:[%s4517_s27] sm:$0xff]  ;;  %v3239_v31 = vld [vmem:[%s3782_s2 + $0x14] sm:$0xf0] }
  0x4b   : > { %1282 = vmatpush.bf16.msra.mxu1 %v3255_v9  ;;  %v3259_v26 = vld [vmem:[%s4517_s27 + $0x88] sm:$0xff]  ;;  %v3250_v29 = vld [vmem:[%s4517_s27 + $0x40] sm:$0xff]  ;;  %v2836_v33 = vld [vmem:[%s3782_s2 + $0x18] sm:$0xf0]  ;;  %v2835_v40 = vor.u32 %v3239_v31, %v2834_v30 }
  0x4c   : > { %1296 = vmatpush.bf16.msra.mxu2 %v3263_v10  ;;  %v3267_v27 = vld [vmem:[%s4517_s27 + $0xc8] sm:$0xff]  ;;  %v3281_v34 = vld [vmem:[%s4517_s27 + $0x138] sm:$0xff]  ;;  %v3258_v36 = vld [vmem:[%s4517_s27 + $0x80] sm:$0xff]  ;;  %v2839_v43 = vor.u32 %v3236_v32, %v2836_v33 }
  0x4d   : > { %1310 = vmatpush.bf16.msra.mxu3 %v3271_v11  ;;  %v3289_v35 = vld [vmem:[%s4517_s27 + $0x178] sm:$0xff]  ;;  %v3266_v37 = vld [vmem:[%s4517_s27 + $0xc0] sm:$0xff]  ;;  %v2842_v38 = vld [vmem:[%s3782_s2 + $0x8] sm:$0xf] }
  0x4e   : > { %1269 = vmatpush.bf16.msra.mxu0 %v3246_v12  ;;  %v3240_v39 = vld [vmem:[%s3782_s2 + $0x1c] sm:$0xf0]  ;;  %v3237_v41 = vld [vmem:[%s3782_s2 + $0xc] sm:$0xf]  ;;  %v2844_v42 = vld [vmem:[%s3782_s2 + $0x20] sm:$0xf0] }
  0x4f   : > { %1283 = vmatpush.bf16.msra.mxu1 %v3254_v13  ;;  %v3280_v44 = vld [vmem:[%s4517_s27 + $0x130] sm:$0xff]  ;;  %v2843_v46 = vor.u32 %v3240_v39, %v2842_v38  ;;  %v2847_v47 = vor.u32 %v3237_v41, %v2844_v42  ;;  %v3279_v48 = vld [vmem:[%s4517_s27 + $0x128] sm:$0xff]  ;;  %v3278_v50 = vld [vmem:[%s4517_s27 + $0x120] sm:$0xff] }
  0x50   : > { %1297 = vmatpush.bf16.msra.mxu2 %v3262_v14  ;;  %v3288_v45 = vld [vmem:[%s4517_s27 + $0x170] sm:$0xff]  ;;  %v3287_v49 = vld [vmem:[%s4517_s27 + $0x168] sm:$0xff]  ;;  %v3286_v51 = vld [vmem:[%s4517_s27 + $0x160] sm:$0xff] }
  0x51   : > { %1311 = vmatpush.bf16.msra.mxu3 %v3270_v15  ;;  %v3277_v52 = vld [vmem:[%s4517_s27 + $0x118] sm:$0xff]  ;;  %v3276_v54 = vld [vmem:[%s4517_s27 + $0x110] sm:$0xff]  ;;  %v3275_v56 = vld [vmem:[%s4517_s27 + $0x108] sm:$0xff] }
  0x52   : > { %1270 = vmatpush.bf16.msra.mxu0 %v3245_v16  ;;  %v3285_v53 = vld [vmem:[%s4517_s27 + $0x158] sm:$0xff]  ;;  %v3284_v55 = vld [vmem:[%s4517_s27 + $0x150] sm:$0xff]  ;;  %v3283_v57 = vld [vmem:[%s4517_s27 + $0x148] sm:$0xff] }
  0x53   : > { %1284 = vmatpush.bf16.msra.mxu1 %v3253_v17  ;;  %v3274_v58 = vld [vmem:[%s4517_s27 + $0x100] sm:$0xff]  ;;  %v2850_v60 = vld [vmem:[%s3782_s2 + $0x10] sm:$0xf]  ;;  %v3241_v61 = vld [vmem:[%s3782_s2 + $0x24] sm:$0xf0] }
  0x54   : > { %1298 = vmatpush.bf16.msra.mxu2 %v3261_v18  ;;  %v3282_v59 = vld [vmem:[%s4517_s27 + $0x140] sm:$0xff]  ;;  %v3238_v62 = vld [vmem:[%s3782_s2 + $0x14] sm:$0xf]  ;;  %v2852_v63 = vld [vmem:[%s3782_s2 + $0x28] sm:$0xf0]  ;;  %v2851_v0 = vor.u32 %v3241_v61, %v2850_v60 }
  0x55   : > { %1312 = vmatpush.bf16.msra.mxu3 %v3269_v19  ;;  %v2855_v1 = vor.u32 %v3238_v62, %v2852_v63  ;;  %v946_v4 = vld [vmem:[%s4518_s23] sm:$0xff]  ;;  %v947_v8 = vld [vmem:[%s4519_s30 + $0x8] sm:$0xff] }
  0x56   : > { %1271 = vmatpush.bf16.msra.mxu0 %v3244_v20 }
  0x57   : > { %1285 = vmatpush.bf16.msra.mxu1 %v3252_v21 }
  0x58   : > { %1299 = vmatpush.bf16.msra.mxu2 %v3260_v22 }
  0x59   : > { %1313 = vmatpush.bf16.msra.mxu3 %v3268_v23 }
  0x5a   : > { %1272 = vmatpush.bf16.msra.mxu0 %v3243_v24 }
  0x5b   : > { %1286 = vmatpush.bf16.msra.mxu1 %v3251_v25 }
  0x5c   : > { %1300 = vmatpush.bf16.msra.mxu2 %v3259_v26 }
  0x5d   : > { %1314 = vmatpush.bf16.msra.mxu3 %v3267_v27 }
  0x5e   : > { %1273 = vmatpush.bf16.msra.mxu0 %v3242_v28 }
  0x5f   : > { %1287 = vmatpush.bf16.msra.mxu1 %v3250_v29 }
  0x60   : > { %1301 = vmatpush.bf16.msra.mxu2 %v3258_v36 }
  0x61   : > { %1315 = vmatpush.bf16.msra.mxu3 %v3266_v37  ;;  %1274 = vmatmul.bf16.vlgmr.msra.gmra.mxu0 %v2835_v40 }
  0x62   : > { %1322 = vmatpush.bf16.msrb.mxu0 %v3281_v34  ;;  %1288 = vmatmul.bf16.vlgmr.msra.gmra.mxu1 %v2839_v43 }
  0x63   : > { %1336 = vmatpush.bf16.msrb.mxu1 %v3289_v35  ;;  %1302 = vmatmul.bf16.vlgmr.msra.gmra.mxu2 %v2843_v46 }
  0x64   : > { %1316 = vmatmul.bf16.vlgmr.msra.gmra.mxu3 %v2847_v47 }
  0x66   : > { %1323 = vmatpush.bf16.msrb.mxu0 %v3280_v44 }
  0x67   : > { %1337 = vmatpush.bf16.msrb.mxu1 %v3288_v45 }
  0x6a   : > { %1324 = vmatpush.bf16.msrb.mxu0 %v3279_v48 }
  0x6b   : > { %1338 = vmatpush.bf16.msrb.mxu1 %v3287_v49 }
  0x6e   : > { %1325 = vmatpush.bf16.msrb.mxu0 %v3278_v50 }
  0x6f   : > { %1339 = vmatpush.bf16.msrb.mxu1 %v3286_v51 }
  0x72   : > { %1326 = vmatpush.bf16.msrb.mxu0 %v3277_v52 }
  0x73   : > { %1340 = vmatpush.bf16.msrb.mxu1 %v3285_v53 }
  0x76   : > { %1327 = vmatpush.bf16.msrb.mxu0 %v3276_v54 }
  0x77   : > { %1341 = vmatpush.bf16.msrb.mxu1 %v3284_v55 }
  0x7a   : > { %1328 = vmatpush.bf16.msrb.mxu0 %v3275_v56 }
  0x7b   : > { %1342 = vmatpush.bf16.msrb.mxu1 %v3283_v57 }
  0x7e   : > { %1329 = vmatpush.bf16.msrb.mxu0 %v3274_v58 }
  0x7f   : > { %1343 = vmatpush.bf16.msrb.mxu1 %v3282_v59 }
  0x81   : > { %1330 = vmatmul.bf16.vlgmr.msrb.gmra.mxu0 %v2851_v0 }
  0x82   : > { %1344 = vmatmul.bf16.vlgmr.msrb.gmra.mxu1 %v2855_v1 }
  0xde   : > { %v1275_v2 = vpop.f32.mrf.mxu0 }
  0xdf   : > { %v1289_v3 = vpop.f32.mrf.mxu1  ;;  %v1276_v5 = vadd.f32 %v1275_v2, %v946_v4 }
  0xe1   : > { %v1290_v7 = vadd.f32 %v1289_v3, %v1276_v5 }
  0xe6   : > { %v1303_v6 = vpop.f32.mrf.mxu2  ;;  %v1277_v9 = vpop.f32.mrf.mxu0 }
  0xe7   : > { %v1291_v10 = vpop.f32.mrf.mxu1  ;;  %v1317_v11 = vpop.f32.mrf.mxu3  ;;  %v1304_v12 = vadd.f32 %v1303_v6, %v1290_v7  ;;  %v1278_v13 = vadd.f32 %v1277_v9, %v947_v8 }
  0xe9   : > { %v1318_v14 = vadd.f32 %v1317_v11, %v1304_v12  ;;  %v1292_v15 = vadd.f32 %v1291_v10, %v1278_v13 }
  0xee   : > { %v1305_v16 = vpop.f32.mrf.mxu2 }
  0xef   : > { %v1306_v20 = vadd.f32 %v1305_v16, %v1292_v15  ;;  %v1319_v22 = vpop.f32.mrf.mxu3 }
  0xf1   : > { %v1320_v23 = vadd.f32 %v1319_v22, %v1306_v20 }
  0xfe   : > { %v1331_v17 = vpop.f32.mrf.mxu0 }
  0xff   : > { %v1345_v18 = vpop.f32.mrf.mxu1  ;;  %v1332_v19 = vadd.f32 %v1331_v17, %v1318_v14 }
 0x101   : > { %v1346_v21 = vadd.f32 %v1345_v18, %v1332_v19 }
 0x103   : > { %1351 = vst.msk [vmem:[#allocation2] sm:$0xff] %vm1350_vm0, %v1346_v21 }
 0x106   : > { %v1333_v24 = vpop.f32.mrf.mxu0 }
 0x107   : > { %v1334_v25 = vadd.f32 %v1333_v24, %v1320_v23  ;;  %v1347_v26 = vpop.f32.mrf.mxu1 }
 0x109   : > { %v1348_v27 = vadd.f32 %v1347_v26, %v1334_v25 }
 0x10b   : > { %1352 = vst.msk [vmem:[#allocation2 + $0x8] sm:$0xff] %vm1350_vm0, %v1348_v27 }
 0x10c PF: > { %v3999_v28 = vld [vmem:[#allocation2] sm:$0xff]  ;;  %vm1359_vm1 = vcmask 523264   ;;  %v3579_v32 = vmov 64.0   ;;  %v3074_v49 = vld [vmem:[%s3788_s18 + $0x30] sm:$0xf]  ;;  %s4520_s17 = sld [smem:[#allocation23_spill]] }
 0x10d   : > { %v1360_v29 = vsel %vm1359_vm1, %v3999_v28, 0.0  ;;  %3418 = vrcp.f32 %v3579_v32  ;;  %v3297_v50 = vld [vmem:[%s3788_s18 + $0x34] sm:$0xf0]  ;;  %v3296_v51 = vld [vmem:[%s3788_s18 + $0x34] sm:$0xf]  ;;  %s4522_s7 = sld [smem:[#allocation24_spill]] }
 0x10e   : > { %1361 = vadd.xlane.f32.xlu0 %v1360_v29  ;;  %v3075_v52 = vor.u32 %v3297_v50, %v3074_v49  ;;  %v3076_v53 = vld [vmem:[%s3788_s18 + $0x38] sm:$0xf0]  ;;  %v3066_v55 = vld [vmem:[%s3788_s18 + $0x20] sm:$0xf]  ;;  %v3295_v56 = vld [vmem:[%s3788_s18 + $0x24] sm:$0xf0] }
 0x10f   : > { %v3079_v54 = vor.u32 %v3296_v51, %v3076_v53  ;;  %v3294_v57 = vld [vmem:[%s3788_s18 + $0x24] sm:$0xf]  ;;  %v3067_v58 = vor.u32 %v3295_v56, %v3066_v55  ;;  %v3068_v59 = vld [vmem:[%s3788_s18 + $0x28] sm:$0xf0]  ;;  %v3058_v61 = vld [vmem:[%s3788_s18 + $0x10] sm:$0xf] }
 0x110   : > { %1483 = vmatpush.bf16.msra.mxu0 %v3075_v52  ;;  %v3071_v60 = vor.u32 %v3294_v57, %v3068_v59  ;;  %v3293_v62 = vld [vmem:[%s3788_s18 + $0x14] sm:$0xf0]  ;;  %v3292_v63 = vld [vmem:[%s3788_s18 + $0x14] sm:$0xf]  ;;  %v3060_v1 = vld [vmem:[%s3788_s18 + $0x18] sm:$0xf0] }
 0x111   : > { %1497 = vmatpush.bf16.msra.mxu1 %v3079_v54  ;;  %v3059_v0 = vor.u32 %v3293_v62, %v3058_v61  ;;  %v3063_v2 = vor.u32 %v3292_v63, %v3060_v1  ;;  %v3050_v3 = vld [vmem:[%s3788_s18] sm:$0xf]  ;;  %v3291_v4 = vld [vmem:[%s3788_s18 + $0x4] sm:$0xf0]  ;;  %v3290_v5 = vld [vmem:[%s3788_s18 + $0x4] sm:$0xf] }
 0x112   : > { %v4003_v30 = vld [vmem:[#allocation2 + $0x8] sm:$0xff]  ;;  %v3051_v7 = vor.u32 %v3291_v4, %v3050_v3  ;;  %s4521_s20 = scalar_lea.vmem %s4520_s17, %s3769_s0  ;;  %s3580_s24 = smov 64   ;;  %vm1520_vm9 = vcmask 130048  }
 0x113   : > { %v1363_v31 = vsel %vm1359_vm1, %v4003_v30, 0.0  ;;  %v3419_v33 = vpop.eup %3418  ;;  %v3052_v8 = vld [vmem:[%s3788_s18 + $0x8] sm:$0xf0]  ;;  %v3412_v29 = vld [vmem:[%s4521_s20] ss:$0 sm:$0xff]  ;;  %s4523_s19 = scalar_lea.vmem %s4522_s7, %s3769_s0  ;;  %s4524_s23 = sld [smem:[#allocation21_spill]] }
 0x114   : > { %v1367_v34 = vmul.f32 64.0, %v3419_v33  ;;  %vm1371_vm2 = vweird.f32 %v3419_v33  ;;  %1484 = vmatpush.bf16.msra.mxu0 %v3067_v58  ;;  %v3055_v10 = vor.u32 %v3290_v5, %v3052_v8  ;;  %s3581_s2 = smov 16   ;;  %s3582_s17 = smov 48  }
 0x115   : > { %1498 = vmatpush.bf16.msra.mxu1 %v3071_v60  ;;  %s3583_s20 = smov 112   ;;  %s3584_s25 = smov 32  }
 0x116   : > { %1364 = vadd.xlane.f32.xlu0 %v1363_v31  ;;  %v1368_v35 = vsub.f32 1.0, %v1367_v34  ;;  %s3585_s16 = smov 96   ;;  %s3586_s7 = smov 80  }
 0x118   : > { %v1369_v36 = vmul.f32 %v3419_v33, %v1368_v35  ;;  %1485 = vmatpush.bf16.msra.mxu0 %v3059_v0  ;;  %v3413_v35 = vld [vmem:[%s4523_s19] ss:$0 sm:$0xff] }
 0x119   : > { %1499 = vmatpush.bf16.msra.mxu1 %v3063_v2  ;;  %s4525_s18 = smov %s4524_s23  ;;  %v4065_v57 = vld [vmem:[%s4524_s23] sm:$0xff]  ;;  %s4533_s23 = scalar_lea.vmem %s4452_s10, %s3769_s0 }
 0x11a   : > { %v1370_v37 = vadd.f32 %v3419_v33, %v1369_v36  ;;  %v4072_v62 = vld [vmem:[%s4525_s18 + $0x8] sm:$0xff] }
 0x11c   : > { %v4007_v38 = vsel %vm1371_vm2, %v3419_v33, %v1370_v37  ;;  %1486 = vmatpush.bf16.msra.mxu0 %v3051_v7 }
 0x11d   : > { %1500 = vmatpush.bf16.msra.mxu1 %v3055_v10 }
 0x181   : > { %v1362_v39 = vpop.xlane.xlu0 %1361 }
 0x182   : > { %v1373_v40 = vmul.f32 %v4007_v38, %v1362_v39 }
 0x184   : > { %v4011_v41 = vsub.f32 %v3999_v28, %v1373_v40 }
 0x186   : > { %v1377_v42 = vmul.f32 %v4011_v41, %v4011_v41 }
 0x188   : > { %v1379_v43 = vsel %vm1359_vm1, %v1377_v42, 0.0 }
 0x189   : > { %1380 = vadd.xlane.f32.xlu1 %v1379_v43  ;;  %v1365_v44 = vpop.xlane.xlu0 %1364  ;;  %v1430_v43 = vld [vmem:[%s3794_s3] sm:$0x3]  ;;  %s4532_s3 = scalar_lea.vmem %s4451_s9, %s3769_s0 }
 0x18a   : > { %v1374_v45 = vmul.f32 %v4007_v38, %v1365_v44  ;;  %v1432_v44 = vperm.slane %v1430_v43, 0 }
 0x18c   : > { %v4018_v46 = vsub.f32 %v4003_v30, %v1374_v45  ;;  %v1433_v45 = vperm.slane %v1430_v43, 1 }
 0x18e   : > { %v1378_v47 = vmul.f32 %v4018_v46, %v4018_v46 }
 0x190   : > { %v1382_v48 = vsel %vm1359_vm1, %v1378_v47, 0.0 }
 0x191   : > { %1383 = vadd.xlane.f32.xlu1 %v1382_v48 }
 0x1fc   : > { %v1381_v6 = vpop.xlane.xlu1 %1380 }
 0x1fd   : > { %v1385_v9 = vmul.f32 %v1381_v6, %v4007_v38 }
 0x1ff   : > { %v1387_v11 = vadd.f32 1e-06, %v1385_v9 }
 0x201   : > { %3420 = vrsqrt.f32 %v1387_v11  ;;  %vm1395_vm4 = vweird.f32 %v1387_v11 }
 0x204   : > { %v1384_v12 = vpop.xlane.xlu1 %1383 }
 0x205   : > { %v1386_v13 = vmul.f32 %v1384_v12, %v4007_v38  ;;  %v3298_v12 = vld [vmem:[%s3800_s26] sm:$0xff] }
 0x207   : > { %v3421_v14 = vpop.eup %3420  ;;  %v1388_v15 = vadd.f32 1e-06, %v1386_v13 }
 0x208   : > { %v1390_v16 = vmul.f32 %v3421_v14, %v1387_v11  ;;  %vm1396_vm3 = vweird.f32 %v3421_v14 }
 0x209   : > { %3422 = vrsqrt.f32 %v1388_v15  ;;  %vm1397_vm5 = vmor %vm1395_vm4, %vm1396_vm3  ;;  %vm1405_vm7 = vweird.f32 %v1388_v15 }
 0x20a   : > { %v1391_v17 = vmul.f32 %v3421_v14, %v1390_v16 }
 0x20c   : > { %v1392_v18 = vmul.f32 0.5, %v1391_v17 }
 0x20e   : > { %v1393_v19 = vsub.f32 1.5, %v1392_v18 }
 0x20f   : > { %v3423_v20 = vpop.eup %3422 }
 0x210   : > { %v1394_v21 = vmul.f32 %v3421_v14, %v1393_v19  ;;  %v1400_v22 = vmul.f32 %v3423_v20, %v1388_v15  ;;  %vm1406_vm6 = vweird.f32 %v3423_v20 }
 0x211   : > { %vm1407_vm8 = vmor %vm1405_vm7, %vm1406_vm6 }
 0x212   : > { %v1401_v23 = vmul.f32 %v3423_v20, %v1400_v22  ;;  %v1398_v24 = vsel %vm1397_vm5, %v3421_v14, %v1394_v21 }
 0x213   : > { %v1409_v27 = vmul.f32 %v1398_v24, %v4011_v41 }
 0x214   : > { %v1402_v25 = vmul.f32 0.5, %v1401_v23 }
 0x215   : > { %v1414_v34 = vmul.f32 %v3412_v29, %v1409_v27 }
 0x216   : > { %v1403_v26 = vsub.f32 1.5, %v1402_v25 }
 0x217   : > { %v1419_v37 = vadd.f32 %v3413_v35, %v1414_v34 }
 0x218   : > { %v1404_v31 = vmul.f32 %v3423_v20, %v1403_v26 }
 0x21a   : > { %v1408_v32 = vsel %vm1407_vm8, %v3423_v20, %v1404_v31 }
 0x21b   : > { %v1410_v33 = vmul.f32 %v1408_v32, %v4018_v46 }
 0x21d   : > { %v1415_v36 = vmul.f32 %v3412_v29, %v1410_v33 }
 0x21f   : > { %v1420_v39 = vadd.f32 %v3413_v35, %v1415_v36 }
 0x221   : > { %v1421_v40 = vpack.c.bf16 %v1420_v39, %v1419_v37 }
 0x223   : > { %3080 = vmatmul.msk.bf16.vlgmr.msra.gmra.mxu0 %vm1359_vm1, %v1421_v40  ;;  %3081 = vmatmul.msk.bf16.vlgmr.msra.gmra.mxu1 %vm1359_vm1, %v1421_v40 }
 0x2a0   : > { %v1488_v41 = vpop.f32.mrf.mxu0  ;;  %v1502_v42 = vpop.f32.mrf.mxu1 }
 0x2a1   : > { %v1489_v48 = vadd.f32 %v1488_v41, %v1432_v44  ;;  %v1503_v49 = vadd.f32 %v1502_v42, %v1433_v45 }
 0x2a8   : > { %v1490_v46 = vpop.f32.mrf.mxu0  ;;  %v1504_v47 = vpop.f32.mrf.mxu1 }
 0x2a9   : > { %v1491_v50 = vadd.f32 %v1490_v46, %v1432_v44  ;;  %v1505_v51 = vadd.f32 %v1504_v47, %v1433_v45 }
 0x2ab   : > { %v1515_v52 = vpack.c.bf16 %v1491_v50, %v1489_v48  ;;  %v4056_v53 = vpack.c.bf16 %v1505_v51, %v1503_v49 }
 0x2ad   : > { %1604 = vmatpush.bf16.msrb.mxu1 %v4056_v53  ;;  %1518 = vrot.lane.b32.xlu2 %v1515_v52, %s3580_s24 }
 0x2b1   : > { %1750 = vmatpush.bf16.msra.mxu1 %v3298_v12 }
 0x307   : > { %v1519_v54 = vpop.permute.xlu2 %1518 }
 0x308   : > { %v1525_v55 = vsel %vm1520_vm9, %v1519_v54, 0 }
 0x309   : > { %1534 = vmatpush.bf16.xpose.msrb.mxu0 %v1525_v55 }
 0x310   : > { %3082 = vmatmul.msk.bf16.vlgmr.msrb.gmra.mxu0 %vm1520_vm9, %v1515_v52 }
 0x38d   : > { %v1536_v56 = vpop.f32.mrf.mxu0 }
 0x38e   : > { %v1541_v58 = vmul.f32 0.25, %v1536_v56 }
 0x390   : > { %v1543_v59 = vadd.f32 %v1541_v58, %v4065_v57 }
 0x392   : > { %v1545_v60 = vsel %vm1520_vm9, %v1543_v59, -inf }
 0x393   : > { %1546 = vmax.xlane.f32.xlu2 %v1545_v60 }
 0x395   : > { %v1538_v61 = vpop.f32.mrf.mxu0 }
 0x396   : > { %v1542_v63 = vmul.f32 0.25, %v1538_v61 }
 0x398   : > { %v1544_v0 = vadd.f32 %v1542_v63, %v4072_v62 }
 0x39a   : > { %v1548_v1 = vsel %vm1520_vm9, %v1544_v0, -inf }
 0x39b   : > { %1549 = vmax.xlane.f32.xlu0 %v1548_v1 }
 0x3ab   : > { %1882 = vrot.lane.b32.xlu2 %v1515_v52, %s3581_s2  ;;  %s4534_s2 = scalar_lea.vmem %s4453_s11, %s3769_s0 }
 0x406   : > { %v1547_v2 = vpop.xlane.xlu2 %1546 }
 0x407   : > { %v1551_v3 = vsub.f32 %v1543_v59, %v1547_v2 }
 0x409   : > { %v1553_v4 = vmul.f32 1.442695, %v1551_v3 }
 0x40b   : > { %3424 = vpow2.f32 %v1553_v4 }
 0x40e   : > { %v1550_v5 = vpop.xlane.xlu0 %1549  ;;  %v1883_v42 = vpop.permute.xlu2 %1882 }
 0x40f   : > { %v1552_v6 = vsub.f32 %v1544_v0, %v1550_v5  ;;  %v1888_v44 = vsel %vm1520_vm9, %v1883_v42, 0 }
 0x411   : > { %v3425_v7 = vpop.eup %3424  ;;  %v1555_v8 = vmul.f32 1.442695, %v1552_v6 }
 0x412   : > { %v1557_v9 = vsel %vm1520_vm9, %v3425_v7, 0.0 }
 0x413   : > { %3426 = vpow2.f32 %v1555_v8  ;;  %1558 = vadd.xlane.f32.xlu1 %v1557_v9 }
 0x419   : > { %v3427_v10 = vpop.eup %3426 }
 0x41a   : > { %v1560_v11 = vsel %vm1520_vm9, %v3427_v10, 0.0 }
 0x41b   : > { %1561 = vadd.xlane.f32.xlu0 %v1560_v11 }
 0x42c   : > { %1614 = vrot.lane.b32.xlu1 %v1515_v52, %s3582_s17  ;;  %s4535_s17 = sld [smem:[#allocation9_spill]] }
 0x42f   : > { %1612 = vrot.lane.b32.xlu0 %v1515_v52, %s3583_s20 }
 0x432   : > { %p3208_p1 = scmp.ne.s32.totalorder %s4535_s17, 1 }
 0x433   : > { %s4539_s17 = sld [smem:[#allocation30_spill]] (!%p3208_p1) }
 0x434   : > { %1759 = vrot.lane.b32.xlu1 %v1515_v52, %s3584_s25 }
 0x437   : > { %1757 = vrot.lane.b32.xlu0 %v1515_v52, %s3585_s16 }
 0x43c   : > { %1880 = vrot.lane.b32.xlu1 %v1515_v52, %s3586_s7 }
 0x486   : > { %v1559_v13 = vpop.xlane.xlu1 %1558 }
 0x487   : > { %3428 = vrcp.f32 %v1559_v13  ;;  %v1574_v22 = vand.u32 2147483648, %v1559_v13  ;;  %vm1568_vm11 = vweird.f32 %v1559_v13  ;;  %v1572_v23 = vand.u32 2147483647, %v1559_v13 }
 0x489   : > { %v1575_v31 = vor.u32 1.1754944e-38, %v1574_v22  ;;  %vm1573_vm14 = vcmp.eq.f32.partialorder %v1572_v23, 8.507059e+37 }
 0x48d   : > { %v3429_v14 = vpop.eup %3428 }
 0x48e   : > { %v1564_v15 = vmul.f32 %v3429_v14, %v1559_v13  ;;  %v1562_v16 = vpop.xlane.xlu0 %1561  ;;  %vm1569_vm10 = vweird.f32 %v3429_v14 }
 0x48f   : > { %3430 = vrcp.f32 %v1562_v16  ;;  %vm1570_vm12 = vmor %vm1568_vm11, %vm1569_vm10  ;;  %v1589_v25 = vand.u32 2147483648, %v1562_v16  ;;  %v1587_v29 = vand.u32 2147483647, %v1562_v16  ;;  %vm1583_vm15 = vweird.f32 %v1562_v16 }
 0x490   : > { %v1565_v17 = vsub.f32 1.0, %v1564_v15 }
 0x491   : > { %v1590_v33 = vor.u32 1.1754944e-38, %v1589_v25  ;;  %vm1588_vm2 = vcmp.eq.f32.partialorder %v1587_v29, 8.507059e+37 }
 0x492   : > { %v1566_v18 = vmul.f32 %v3429_v14, %v1565_v17 }
 0x494   : > { %v1567_v20 = vadd.f32 %v3429_v14, %v1566_v18 }
 0x495   : > { %v3431_v19 = vpop.eup %3430 }
 0x496   : > { %v1579_v21 = vmul.f32 %v3431_v19, %v1562_v16  ;;  %v1571_v26 = vsel %vm1570_vm12, %v3429_v14, %v1567_v20  ;;  %vm1584_vm13 = vweird.f32 %v3431_v19 }
 0x497   : > { %vm1585_vm0 = vmor %vm1583_vm15, %vm1584_vm13  ;;  %v1576_v34 = vsel %vm1573_vm14, %v1575_v31, %v1571_v26 }
 0x498   : > { %v1580_v24 = vsub.f32 1.0, %v1579_v21  ;;  %v1577_v40 = vmul.f32 %v3425_v7, %v1576_v34 }
 0x49a   : > { %v1581_v27 = vmul.f32 %v3431_v19, %v1580_v24 }
 0x49c   : > { %v1582_v32 = vadd.f32 %v3431_v19, %v1581_v27 }
 0x49e   : > { %v1586_v35 = vsel %vm1585_vm0, %v3431_v19, %v1582_v32  ;;  %v1615_v36 = vpop.permute.xlu1 %1614 }
 0x49f   : > { %v1620_v37 = vsel %vm1520_vm9, %v1615_v36, 0  ;;  %v1591_v39 = vsel %vm1588_vm2, %v1590_v33, %v1586_v35 }
 0x4a0   : > { %1629 = vmatpush.bf16.xpose.msra.mxu3 %v1620_v37  ;;  %v1592_v41 = vmul.f32 %v3427_v10, %v1591_v39 }
 0x4a1   : > { %v1613_v45 = vpop.permute.xlu0 %1612 }
 0x4a2   : > { %v1593_v43 = vpack.c.bf16 %v1592_v41, %v1577_v40 }
 0x4a4   : > { %3083 = vmatmul.msk.bf16.vlgmr.msrb.gmra.mxu1 %vm1520_vm9, %v1593_v43 }
 0x4a5   : > { %1897 = vmatpush.bf16.xpose.msrb.mxu1 %v1888_v44 }
 0x4a6   : > { %v1760_v46 = vpop.permute.xlu1 %1759 }
 0x4a7   : > { %3084 = vmatmul.msk.bf16.vlgmr.msra.gmra.mxu3 %vm1520_vm9, %v1613_v45  ;;  %v1765_v47 = vsel %vm1520_vm9, %v1760_v46, 0 }
 0x4a8   : > { %1774 = vmatpush.bf16.xpose.msrb.mxu3 %v1765_v47 }
 0x4a9   : > { %v1758_v48 = vpop.permute.xlu0 %1757 }
 0x4ae   : > { %v1881_v0 = vpop.permute.xlu1 %1880 }
 0x4b7   : > { %3096 = vmatmul.msk.bf16.vlgmr.msrb.gmra.mxu3 %vm1520_vm9, %v1758_v48 }
 0x521   : > { %v1606_v49 = vpop.f32.mrf.mxu1 }
 0x529   : > { %v1608_v50 = vpop.f32.mrf.mxu1 }
 0x52a   : > { %v1611_v51 = vpack.c.bf16 %v1608_v50, %v1606_v49  ;;  %v1631_v52 = vpop.f32.mrf.mxu3 }
 0x52b   : > { %v1636_v54 = vmul.f32 0.25, %v1631_v52 }
 0x52c   : > { %3095 = vmatmul.msk.bf16.vlgmr.msra.gmra.mxu1 %vm1520_vm9, %v1611_v51 }
 0x52d   : > { %v1638_v55 = vadd.f32 %v1636_v54, %v4065_v57 }
 0x52f   : > { %v1640_v56 = vsel %vm1520_vm9, %v1638_v55, -inf }
 0x530   : > { %1641 = vmax.xlane.f32.xlu0 %v1640_v56 }
 0x532   : > { %v1633_v58 = vpop.f32.mrf.mxu3 }
 0x533   : > { %v1637_v59 = vmul.f32 0.25, %v1633_v58 }
 0x535   : > { %v1639_v60 = vadd.f32 %v1637_v59, %v4072_v62 }
 0x537   : > { %v1643_v61 = vsel %vm1520_vm9, %v1639_v60, -inf }
 0x538   : > { %1644 = vmax.xlane.f32.xlu1 %v1643_v61 }
 0x53a   : > { %v1776_v63 = vpop.f32.mrf.mxu3 }
 0x53b   : > { %v1781_v1 = vmul.f32 0.25, %v1776_v63 }
 0x53c   : > { %3103 = vmatmul.msk.bf16.vlgmr.msrb.gmra.mxu1 %vm1520_vm9, %v1881_v0 }
 0x53d   : > { %v1783_v2 = vadd.f32 %v1781_v1, %v4065_v57 }
 0x53f   : > { %v1785_v3 = vsel %vm1520_vm9, %v1783_v2, -inf }
 0x540   : > { %1786 = vmax.xlane.f32.xlu1 %v1785_v3 }
 0x542   : > { %v1778_v26 = vpop.f32.mrf.mxu3 }
 0x543   : > { %v1782_v29 = vmul.f32 0.25, %v1778_v26 }
 0x545   : > { %v1784_v32 = vadd.f32 %v1782_v29, %v4072_v62 }
 0x547   : > { %v1788_v33 = vsel %vm1520_vm9, %v1784_v32, -inf }
 0x5a3   : > { %v1642_v9 = vpop.xlane.xlu0 %1641 }
 0x5a4   : > { %v1646_v12 = vsub.f32 %v1638_v55, %v1642_v9 }
 0x5a6   : > { %v1648_v16 = vmul.f32 1.442695, %v1646_v12 }
 0x5a9   : > { %v4096_v4 = vpop.f32.mrf.mxu1 }
 0x5ab   : > { %v1645_v5 = vpop.xlane.xlu1 %1644 }
 0x5ac   : > { %v1647_v6 = vsub.f32 %v1639_v60, %v1645_v5 }
 0x5ae   : > { %v1650_v7 = vmul.f32 1.442695, %v1647_v6 }
 0x5b0   : > { %3432 = vpow2.f32 %v1650_v7 }
 0x5b1   : > { %v4098_v8 = vpop.f32.mrf.mxu1 }
 0x5b3   : > { %v1787_v10 = vpop.xlane.xlu1 %1786 }
 0x5b4   : > { %v1791_v11 = vsub.f32 %v1783_v2, %v1787_v10 }
 0x5b6   : > { %v4100_v13 = vpop.eup %3432  ;;  %v1793_v14 = vmul.f32 1.442695, %v1791_v11 }
 0x5b7   : > { %v1655_v15 = vsel %vm1520_vm9, %v4100_v13, 0.0 }
 0x5b8   : > { %3434 = vpow2.f32 %v1793_v14  ;;  %1656 = vadd.xlane.f32.xlu1 %v1655_v15 }
 0x5b9   : > { %v1899_v17 = vpop.f32.mrf.mxu1  ;;  %3436 = vpow2.f32 %v1648_v16 }
 0x5ba   : > { %v1904_v18 = vmul.f32 0.25, %v1899_v17 }
 0x5bc   : > { %v1906_v19 = vadd.f32 %v1904_v18, %v4065_v57 }
 0x5be   : > { %v4105_v20 = vpop.eup %3434  ;;  %v1908_v21 = vsel %vm1520_vm9, %v1906_v19, -inf }
 0x5bf   : > { %1909 = vmax.xlane.f32.xlu2 %v1908_v21  ;;  %v1797_v22 = vsel %vm1520_vm9, %v4105_v20, 0.0  ;;  %v4110_v25 = vpop.eup %3436 }
 0x5c0   : > { %1798 = vadd.xlane.f32.xlu1 %v1797_v22  ;;  %v1652_v31 = vsel %vm1520_vm9, %v4110_v25, 0.0 }
 0x5c1   : > { %v1901_v23 = vpop.f32.mrf.mxu1 }
 0x5c2   : > { %v1905_v24 = vmul.f32 0.25, %v1901_v23 }
 0x5c4   : > { %v1907_v27 = vadd.f32 %v1905_v24, %v4072_v62 }
 0x5c6   : > { %v1911_v57 = vsel %vm1520_vm9, %v1907_v27, -inf }
 0x5c7   : > { %1912 = vmax.xlane.f32.xlu0 %v1911_v57  ;;  %1653 = vadd.xlane.f32.xlu2 %v1652_v31 }
 0x5cf   : > { %1789 = vmax.xlane.f32.xlu0 %v1788_v33 }
 0x5d9   : > { %1957 = vrot.lane.b32.xlu1 %v4056_v53, %s3586_s7 }
 0x62b   : > { %v1657_v34 = vpop.xlane.xlu1 %1656 }
 0x62c   : > { %v1684_v5 = vand.u32 2147483648, %v1657_v34  ;;  %vm1678_vm7 = vweird.f32 %v1657_v34 }
 0x62e   : > { %v1685_v11 = vor.u32 1.1754944e-38, %v1684_v5 }
 0x632   : > { %v1910_v39 = vpop.xlane.xlu2 %1909 }
 0x633   : > { %v4120_v41 = vpop.xlane.xlu1 %1798  ;;  %v1914_v43 = vsub.f32 %v1906_v19, %v1910_v39 }
 0x634   : > { %vm1808_vm0 = vweird.f32 %v4120_v41 }
 0x635   : > { %v1916_v46 = vmul.f32 1.442695, %v1914_v43 }
 0x63a   : > { %v1913_v35 = vpop.xlane.xlu0 %1912  ;;  %v1654_v52 = vpop.xlane.xlu2 %1653 }
 0x63b   : > { %v1915_v36 = vsub.f32 %v1907_v27, %v1913_v35  ;;  %v1669_v1 = vand.u32 2147483648, %v1654_v52  ;;  %vm1663_vm5 = vweird.f32 %v1654_v52  ;;  %v1667_v3 = vand.u32 2147483647, %v1654_v52 }
 0x63c   : > { %v1814_v35 = vand.u32 2147483648, %v4120_v41 }
 0x63d   : > { %v1918_v37 = vmul.f32 1.442695, %v1915_v36  ;;  %v1670_v9 = vor.u32 1.1754944e-38, %v1669_v1  ;;  %vm1668_vm10 = vcmp.eq.f32.partialorder %v1667_v3, 8.507059e+37 }
 0x63f   : > { %3438 = vpow2.f32 %v1918_v37 }
 0x642   : > { %v1790_v40 = vpop.xlane.xlu0 %1789 }
 0x643   : > { %v1792_v42 = vsub.f32 %v1784_v32, %v1790_v40 }
 0x645   : > { %v1795_v44 = vmul.f32 1.442695, %v1792_v42  ;;  %v4122_v45 = vpop.eup %3438 }
 0x646   : > { %v1923_v62 = vsel %vm1520_vm9, %v4122_v45, 0.0 }
 0x647   : > { %3440 = vpow2.f32 %v1795_v44  ;;  %1924 = vadd.xlane.f32.xlu2 %v1923_v62 }
 0x648   : > { %3442 = vpow2.f32 %v1916_v46 }
 0x649   : > { %3444 = vrcp.f32 %v1654_v52 }
 0x64a   : > { %3446 = vrcp.f32 %v1657_v34 }
 0x64b   : > { %v1958_v47 = vpop.permute.xlu1 %1957 }
 0x64c   : > { %1970 = vmatpush.bf16.msra.mxu3 %v1958_v47 }
 0x64d   : > { %v4126_v48 = vpop.eup %3440 }
 0x64e   : > { %v1800_v49 = vsel %vm1520_vm9, %v4126_v48, 0.0  ;;  %v4130_v50 = vpop.eup %3442 }
 0x64f   : > { %1801 = vadd.xlane.f32.xlu0 %v1800_v49  ;;  %v1920_v51 = vsel %vm1520_vm9, %v4130_v50, 0.0  ;;  %v3445_v54 = vpop.eup %3444  ;;  %v1812_v49 = vand.u32 2147483647, %v4120_v41 }
 0x650   : > { %v3447_v55 = vpop.eup %3446  ;;  %v1659_v56 = vmul.f32 %v3445_v54, %v1654_v52  ;;  %vm1664_vm3 = vweird.f32 %v3445_v54 }
 0x651   : > { %v1674_v58 = vmul.f32 %v3447_v55, %v1657_v34  ;;  %vm1679_vm4 = vweird.f32 %v3447_v55  ;;  %vm1665_vm6 = vmor %vm1663_vm5, %vm1664_vm3 }
 0x652   : > { %v1660_v59 = vsub.f32 1.0, %v1659_v56  ;;  %vm1680_vm8 = vmor %vm1678_vm7, %vm1679_vm4  ;;  %v3309_v56 = vld [vmem:[%s3817_s5 + $0x34] sm:$0xf0] }
 0x653   : > { %v1675_v60 = vsub.f32 1.0, %v1674_v58 }
 0x654   : > { %v1661_v61 = vmul.f32 %v3445_v54, %v1660_v59 }
 0x655   : > { %v1676_v63 = vmul.f32 %v3447_v55, %v1675_v60 }
 0x656   : > { %v1662_v0 = vadd.f32 %v3445_v54, %v1661_v61  ;;  %v1815_v61 = vor.u32 1.1754944e-38, %v1814_v35 }
 0x657   : > { %1921 = vadd.xlane.f32.xlu0 %v1920_v51  ;;  %v1677_v2 = vadd.f32 %v3447_v55, %v1676_v63 }
 0x658   : > { %v1666_v7 = vsel %vm1665_vm6, %v3445_v54, %v1662_v0 }
 0x659   : > { %v1681_v10 = vsel %vm1680_vm8, %v3447_v55, %v1677_v2  ;;  %v1671_v12 = vsel %vm1668_vm10, %v1670_v9, %v1666_v7 }
 0x65a   : > { %v1672_v15 = vmul.f32 %v4110_v25, %v1671_v12 }
 0x65f   : > { %1690 = vrot.lane.b32.xlu2 %v4056_v53, %s3583_s20  ;;  %s4536_s20 = sld [smem:[#allocation29_spill]] (!%p3208_p1) }
 0x66b   : > { %1834 = vrot.lane.b32.xlu0 %v4056_v53, %s3585_s16  ;;  %v1682_v53 = vand.u32 2147483647, %v1657_v34 }
 0x66d   : > { %vm1683_vm11 = vcmp.eq.f32.partialorder %v1682_v53, 8.507059e+37 }
 0x66e   : > { %v1686_v14 = vsel %vm1683_vm11, %v1685_v11, %v1681_v10  ;;  %vm1813_vm11 = vcmp.eq.f32.partialorder %v1812_v49, 8.507059e+37 }
 0x66f   : > { %v1687_v19 = vmul.f32 %v4100_v13, %v1686_v14 }
 0x671   : > { %v1688_v22 = vpack.c.bf16 %v1687_v19, %v1672_v15 }
 0x6ba   : > { %v4138_v6 = vpop.xlane.xlu2 %1924 }
 0x6bb   : > { %3448 = vrcp.f32 %v4138_v6  ;;  %v1952_v43 = vand.u32 2147483648, %v4138_v6  ;;  %vm1946_vm2 = vweird.f32 %v4138_v6  ;;  %v1950_v62 = vand.u32 2147483647, %v4138_v6 }
 0x6bc   : > { %3450 = vrcp.f32 %v4120_v41 }
 0x6bd   : > { %v1953_v63 = vor.u32 1.1754944e-38, %v1952_v43  ;;  %vm1951_vm8 = vcmp.eq.f32.partialorder %v1950_v62, 8.507059e+37 }
 0x6c1   : > { %v3449_v17 = vpop.eup %3448 }
 0x6c2   : > { %v1802_v16 = vpop.xlane.xlu0 %1801  ;;  %v1691_v18 = vpop.permute.xlu2 %1690  ;;  %v1942_v23 = vmul.f32 %v3449_v17, %v4138_v6  ;;  %vm1947_vm14 = vweird.f32 %v3449_v17 }
 0x6c3   : > { %3452 = vrcp.f32 %v1802_v16  ;;  %v3451_v21 = vpop.eup %3450  ;;  %1703 = vmatpush.bf16.msra.mxu2 %v1691_v18  ;;  %v1829_v37 = vand.u32 2147483648, %v1802_v16  ;;  %vm1823_vm15 = vweird.f32 %v1802_v16  ;;  %v1827_v44 = vand.u32 2147483647, %v1802_v16  ;;  %vm4157_vm4 = vmor %vm1946_vm2, %vm1947_vm14 }
 0x6c4   : > { %v1804_v24 = vmul.f32 %v3451_v21, %v4120_v41  ;;  %v1943_v27 = vsub.f32 1.0, %v1942_v23  ;;  %vm1809_vm13 = vweird.f32 %v3451_v21 }
 0x6c5   : > { %v1830_v54 = vor.u32 1.1754944e-38, %v1829_v37  ;;  %vm4164_vm5 = vmor %vm1808_vm0, %vm1809_vm13  ;;  %vm1828_vm7 = vcmp.eq.f32.partialorder %v1827_v44, 8.507059e+37 }
 0x6c6   : > { %3085 = vmatmul.msk.bf16.vlgmr.msra.gmra.mxu2 %vm1520_vm9, %v1688_v22  ;;  %v1805_v25 = vsub.f32 1.0, %v1804_v24  ;;  %v1944_v32 = vmul.f32 %v3449_v17, %v1943_v27 }
 0x6c8   : > { %v1806_v34 = vmul.f32 %v3451_v21, %v1805_v25  ;;  %v1945_v39 = vadd.f32 %v3449_v17, %v1944_v32 }
 0x6c9   : > { %v3453_v26 = vpop.eup %3452 }
 0x6ca   : > { %v1819_v29 = vmul.f32 %v3453_v26, %v1802_v16  ;;  %v1922_v57 = vpop.xlane.xlu0 %1921  ;;  %vm1824_vm12 = vweird.f32 %v3453_v26  ;;  %v1807_v42 = vadd.f32 %v3451_v21, %v1806_v34  ;;  %v1949_v58 = vsel %vm4157_vm4, %v3449_v17, %v1945_v39  ;;  %v3299_v16 = vld [vmem:[%s3800_s26 + $0x8] sm:$0xff]  ;;  %v3301_v17 = vld [vmem:[%s3800_s26 + $0x18] sm:$0xff] }
 0x6cb   : > { %3454 = vrcp.f32 %v1922_v57  ;;  %vm4152_vm3 = vmor %vm1823_vm15, %vm1824_vm12  ;;  %v1937_v55 = vand.u32 2147483648, %v1922_v57  ;;  %v1935_v41 = vand.u32 2147483647, %v1922_v57  ;;  %vm1931_vm10 = vweird.f32 %v1922_v57  ;;  %1727 = vmatpush.bf16.msra.mxu0 %v3299_v16  ;;  %v3303_v16 = vld [vmem:[%s3817_s5 + $0x4] sm:$0xf0] }
 0x6cc   : > { %v1820_v31 = vsub.f32 1.0, %v1819_v29  ;;  %v1811_v60 = vsel %vm4164_vm5, %v3451_v21, %v1807_v42  ;;  %v1954_v2 = vsel %vm1951_vm8, %v1953_v63, %v1949_v58  ;;  %v3308_v58 = vld [vmem:[%s3817_s5 + $0x34] sm:$0xf]  ;;  %v3307_v63 = vld [vmem:[%s3817_s5 + $0x24] sm:$0xf0] }
 0x6cd   : > { %v1938_v3 = vor.u32 1.1754944e-38, %v1937_v55  ;;  %vm1936_vm13 = vcmp.eq.f32.partialorder %v1935_v41, 8.507059e+37  ;;  %v1816_v53 = vsel %vm1813_vm11, %v1815_v61, %v1811_v60  ;;  %v1955_v9 = vmul.f32 %v4122_v45, %v1954_v2  ;;  %v3136_v55 = vld [vmem:[%s3817_s5 + $0x30] sm:$0xf]  ;;  %v3138_v41 = vld [vmem:[%s3817_s5 + $0x38] sm:$0xf0] }
 0x6ce   : > { %v1821_v33 = vmul.f32 %v3453_v26, %v1820_v31  ;;  %v1817_v12 = vmul.f32 %v4105_v20, %v1816_v53  ;;  %v3141_v60 = vor.u32 %v3308_v58, %v3138_v41  ;;  %v3128_v61 = vld [vmem:[%s3817_s5 + $0x20] sm:$0xf]  ;;  %v3130_v2 = vld [vmem:[%s3817_s5 + $0x28] sm:$0xf0]  ;;  %v3305_v53 = vld [vmem:[%s3817_s5 + $0x14] sm:$0xf0] }
 0x6d0   : > { %v1822_v36 = vadd.f32 %v3453_v26, %v1821_v33  ;;  %v3414_v33 = vld [vmem:[%s4532_s3] ss:$0 sm:$0xff]  ;;  %2143 = vmatpush.bf16.msra.mxu1 %v3141_v60 }
 0x6d1   : > { %v3455_v13 = vpop.eup %3454 }
 0x6d2   : > { %v1927_v40 = vmul.f32 %v3455_v13, %v1922_v57  ;;  %v1826_v52 = vsel %vm4152_vm3, %v3453_v26, %v1822_v36  ;;  %vm1932_vm6 = vweird.f32 %v3455_v13 }
 0x6d3   : > { %v1831_v1 = vsel %vm1828_vm7, %v1830_v54, %v1826_v52  ;;  %vm1933_vm12 = vmor %vm1931_vm10, %vm1932_vm6 }
 0x6d4   : > { %v1928_v47 = vsub.f32 1.0, %v1927_v40  ;;  %v1832_v7 = vmul.f32 %v4126_v48, %v1831_v1  ;;  %v3300_v48 = vld [vmem:[%s3800_s26 + $0x10] sm:$0xff]  ;;  %v3129_v1 = vor.u32 %v3307_v63, %v3128_v61 }
 0x6d5   : > { %1871 = vmatpush.bf16.msrb.mxu0 %v3300_v48  ;;  %v3114_v48 = vld [vmem:[%s3817_s5 + $0x8] sm:$0xf0] }
 0x6d6   : > { %v1929_v59 = vmul.f32 %v3455_v13, %v1928_v47  ;;  %v1833_v15 = vpack.c.bf16 %v1832_v7, %v1817_v12 }
 0x6d8   : > { %v1930_v0 = vadd.f32 %v3455_v13, %v1929_v59  ;;  %v3137_v59 = vor.u32 %v3309_v56, %v3136_v55 }
 0x6da   : > { %v1934_v5 = vsel %vm1933_vm12, %v3455_v13, %v1930_v0  ;;  %v3306_v0 = vld [vmem:[%s3817_s5 + $0x24] sm:$0xf] }
 0x6db   : > { %v1939_v6 = vsel %vm1936_vm13, %v1938_v3, %v1934_v5  ;;  %v3133_v3 = vor.u32 %v3306_v0, %v3130_v2  ;;  %v3120_v5 = vld [vmem:[%s3817_s5 + $0x10] sm:$0xf]  ;;  %v3325_v2 = vld [vmem:[%s3832_s6 + $0x78] sm:$0xff] }
 0x6dc   : > { %v1940_v10 = vmul.f32 %v4130_v50, %v1939_v6  ;;  %v3304_v6 = vld [vmem:[%s3817_s5 + $0x14] sm:$0xf] }
 0x6dd   : > { %v1835_v11 = vpop.permute.xlu0 %1834  ;;  %2144 = vmatpush.bf16.msra.mxu1 %v3133_v3 }
 0x6de   : > { %1847 = vmatpush.bf16.msrb.mxu2 %v1835_v11  ;;  %v1956_v14 = vpack.c.bf16 %v1955_v9, %v1940_v10  ;;  %v3121_v9 = vor.u32 %v3305_v53, %v3120_v5  ;;  %v3122_v10 = vld [vmem:[%s3817_s5 + $0x18] sm:$0xf0]  ;;  %v3316_v53 = vld [vmem:[%s3832_s6 + $0x30] sm:$0xff] }
 0x6df   : > { %v3125_v12 = vor.u32 %v3304_v6, %v3122_v10 }
 0x6e0   : > { %3104 = vmatmul.msk.bf16.vlgmr.msra.gmra.mxu3 %vm1520_vm9, %v1956_v14 }
 0x6e1   : > { %3097 = vmatmul.msk.bf16.vlgmr.msrb.gmra.mxu2 %vm1520_vm9, %v1833_v15  ;;  %2145 = vmatpush.bf16.msra.mxu1 %v3125_v12  ;;  %v3112_v15 = vld [vmem:[%s3817_s5] sm:$0xf] }
 0x6e2   : > { %1994 = vmatpush.bf16.msra.mxu2 %v3301_v17  ;;  %v3113_v17 = vor.u32 %v3303_v16, %v3112_v15  ;;  %v3323_v15 = vld [vmem:[%s3832_s6 + $0x68] sm:$0xff] }
 0x6e6   : > { %2457 = vmatpush.bf16.msrb.mxu2 %v3325_v2 }
 0x749   : > { %v1705_v18 = vpop.f32.mrf.mxu2 }
 0x751   : > { %v1707_v45 = vpop.f32.mrf.mxu2 }
 0x752   : > { %v1710_v19 = vpack.c.bf16 %v1707_v45, %v1705_v18  ;;  %v3302_v18 = vld [vmem:[%s3817_s5 + $0x4] sm:$0xf] }
 0x753   : > { %v3117_v45 = vor.u32 %v3302_v18, %v3114_v48 }
 0x754   : > { %3090 = vmatmul.msk.bf16.vlgmr.msra.gmra.mxu0 %vm1520_vm9, %v1710_v19 }
 0x755   : > { %2129 = vmatpush.bf16.msra.mxu0 %v3137_v59  ;;  %2146 = vmatpush.bf16.msra.mxu1 %v3117_v45 }
 0x759   : > { %2130 = vmatpush.bf16.msra.mxu0 %v3129_v1  ;;  %v3317_v1 = vld [vmem:[%s3832_s6 + $0x38] sm:$0xff] }
 0x75a   : > { %2443 = vmatpush.bf16.msrb.mxu3 %v3317_v1 }
 0x75d   : > { %2131 = vmatpush.bf16.msra.mxu0 %v3121_v9 }
 0x75e   : > { %2444 = vmatpush.bf16.msrb.mxu3 %v3316_v53 }
 0x761   : > { %2132 = vmatpush.bf16.msra.mxu0 %v3113_v17 }
 0x763   : > { %v1972_v20 = vpop.f32.mrf.mxu3 }
 0x764   : > { %v1849_v50 = vpop.f32.mrf.mxu2 }
 0x76b   : > { %v1974_v21 = vpop.f32.mrf.mxu3 }
 0x76c   : > { %v1977_v22 = vpack.c.bf16 %v1974_v21, %v1972_v20  ;;  %v1851_v23 = vpop.f32.mrf.mxu2 }
 0x76d   : > { %v1854_v24 = vpack.c.bf16 %v1851_v23, %v1849_v50 }
 0x76e   : > { %3109 = vmatmul.msk.bf16.vlgmr.msra.gmra.mxu2 %vm1520_vm9, %v1977_v22 }
 0x76f   : > { %3102 = vmatmul.msk.bf16.vlgmr.msrb.gmra.mxu0 %vm1520_vm9, %v1854_v24 }
 0x7d1   : > { %v1729_v26 = vpop.f32.mrf.mxu0 }
 0x7d2   : > { %v1753_v57 = vadd.f32 %v4096_v4, %v1729_v26 }
 0x7d9   : > { %v1731_v27 = vpop.f32.mrf.mxu0 }
 0x7da   : > { %v1755_v35 = vadd.f32 %v4098_v8, %v1731_v27 }
 0x7ec   : > { %v1873_v29 = vpop.f32.mrf.mxu0 }
 0x7ed   : > { %v1878_v25 = vadd.f32 %v1873_v29, %v1753_v57 }
 0x7f1   : > { %v1996_v31 = vpop.f32.mrf.mxu2 }
 0x7f2   : > { %v2001_v32 = vadd.f32 %v1996_v31, %v1878_v25 }
 0x7f4   : > { %v2003_v34 = vadd.f32 %v2001_v32, %v3999_v28  ;;  %v1875_v13 = vpop.f32.mrf.mxu0 }
 0x7f5   : > { %v1879_v37 = vadd.f32 %v1875_v13, %v1755_v35 }
 0x7f6   : > { %v4192_v36 = vadd.f32 %v3414_v33, %v2003_v34  ;;  %v3415_v34 = vld [vmem:[%s4533_s23] ss:$0 sm:$0xff]  ;;  %s4537_s23 = sld [smem:[#allocation27_spill]] (!%p3208_p1) }
 0x7f8   : > { %v2013_v39 = vsel %vm1359_vm1, %v4192_v36, 0.0 }
 0x7f9   : > { %v1998_v4 = vpop.f32.mrf.mxu2  ;;  %2014 = vadd.xlane.f32.xlu0 %v2013_v39  ;;  %v3416_v39 = vld [vmem:[%s4534_s2] ss:$0 sm:$0xff]  ;;  %s4538_s2 = sld [smem:[#allocation28_spill]] (!%p3208_p1) }
 0x7fa   : > { %v2002_v40 = vadd.f32 %v1998_v4, %v1879_v37 }
 0x7fc   : > { %v2004_v42 = vadd.f32 %v2002_v40, %v4003_v30 }
 0x7fe   : > { %v4197_v43 = vadd.f32 %v3414_v33, %v2004_v42 }
 0x800   : > { %v2016_v28 = vsel %vm1359_vm1, %v4197_v43, 0.0 }
 0x801   : > { %2017 = vadd.xlane.f32.xlu2 %v2016_v28 }
 0x86c   : > { %v2015_v8 = vpop.xlane.xlu0 %2014 }
 0x86d   : > { %v2019_v44 = vmul.f32 %v2015_v8, %v4007_v38 }
 0x86f   : > { %v4203_v62 = vsub.f32 %v4192_v36, %v2019_v44 }
 0x871   : > { %v2023_v46 = vmul.f32 %v4203_v62, %v4203_v62 }
 0x873   : > { %v2025_v30 = vsel %vm1359_vm1, %v2023_v46, 0.0 }
 0x874   : > { %2026 = vadd.xlane.f32.xlu1 %v2025_v30  ;;  %v2018_v47 = vpop.xlane.xlu2 %2017 }
 0x875   : > { %v2020_v49 = vmul.f32 %v2018_v47, %v4007_v38 }
 0x877   : > { %v4210_v51 = vsub.f32 %v4197_v43, %v2020_v49 }
 0x879   : > { %v2024_v52 = vmul.f32 %v4210_v51, %v4210_v51 }
 0x87b   : > { %v2028_v54 = vsel %vm1359_vm1, %v2024_v52, 0.0 }
 0x87c   : > { %2029 = vadd.xlane.f32.xlu2 %v2028_v54 }
 0x8e7   : > { %v2027_v7 = vpop.xlane.xlu1 %2026 }
 0x8e8   : > { %v2031_v11 = vmul.f32 %v2027_v7, %v4007_v38  ;;  %v3324_v7 = vld [vmem:[%s3832_s6 + $0x70] sm:$0xff] }
 0x8e9   : > { %2458 = vmatpush.bf16.msrb.mxu2 %v3324_v7 }
 0x8ea   : > { %v2033_v14 = vadd.f32 1e-06, %v2031_v11 }
 0x8ec   : > { %3456 = vrsqrt.f32 %v2033_v14  ;;  %vm2041_vm14 = vweird.f32 %v2033_v14 }
 0x8ed   : > { %2459 = vmatpush.bf16.msrb.mxu2 %v3323_v15 }
 0x8ef   : > { %v2030_v19 = vpop.xlane.xlu2 %2029 }
 0x8f0   : > { %v2032_v20 = vmul.f32 %v2030_v19, %v4007_v38 }
 0x8f2   : > { %v3457_v50 = vpop.eup %3456  ;;  %v2034_v21 = vadd.f32 1e-06, %v2032_v20 }
 0x8f3   : > { %v2036_v22 = vmul.f32 %v3457_v50, %v2033_v14  ;;  %vm2042_vm9 = vweird.f32 %v3457_v50  ;;  %v3315_v14 = vld [vmem:[%s3832_s6 + $0x28] sm:$0xff] }
 0x8f4   : > { %3458 = vrsqrt.f32 %v2034_v21  ;;  %vm2043_vm15 = vmor %vm2041_vm14, %vm2042_vm9  ;;  %vm2051_vm2 = vweird.f32 %v2034_v21  ;;  %2445 = vmatpush.bf16.msrb.mxu3 %v3315_v14 }
 0x8f5   : > { %v2037_v23 = vmul.f32 %v3457_v50, %v2036_v22 }
 0x8f7   : > { %v2038_v24 = vmul.f32 0.5, %v2037_v23 }
 0x8f9   : > { %v2039_v26 = vsub.f32 1.5, %v2038_v24 }
 0x8fa   : > { %v3459_v27 = vpop.eup %3458 }
 0x8fb   : > { %v2040_v29 = vmul.f32 %v3457_v50, %v2039_v26  ;;  %v2046_v57 = vmul.f32 %v3459_v27, %v2034_v21  ;;  %vm2052_vm0 = vweird.f32 %v3459_v27 }
 0x8fc   : > { %vm2053_vm3 = vmor %vm2051_vm2, %vm2052_vm0 }
 0x8fd   : > { %v2047_v25 = vmul.f32 %v3459_v27, %v2046_v57  ;;  %v2044_v31 = vsel %vm2043_vm15, %v3457_v50, %v2040_v29  ;;  %v3322_v29 = vld [vmem:[%s3832_s6 + $0x60] sm:$0xff] }
 0x8fe   : > { %v2055_v13 = vmul.f32 %v2044_v31, %v4203_v62  ;;  %v2076_v62 = vld [vmem:[%s3822_s28] sm:$0x3]  ;;  %2460 = vmatpush.bf16.msrb.mxu2 %v3322_v29 }
 0x8ff   : > { %v2048_v32 = vmul.f32 0.5, %v2047_v25  ;;  %v2078_v46 = vperm.slane %v2076_v62, 0  ;;  %v2079_v30 = vperm.slane %v2076_v62, 1 }
 0x900   : > { %v2060_v4 = vmul.f32 %v3415_v34, %v2055_v13 }
 0x901   : > { %v2049_v33 = vsub.f32 1.5, %v2048_v32 }
 0x902   : > { %v2065_v28 = vadd.f32 %v3416_v39, %v2060_v4 }
 0x903   : > { %v2050_v35 = vmul.f32 %v3459_v27, %v2049_v33 }
 0x905   : > { %v2054_v37 = vsel %vm2053_vm3, %v3459_v27, %v2050_v35  ;;  %v3314_v27 = vld [vmem:[%s3832_s6 + $0x20] sm:$0xff]  ;;  %v3313_v35 = vld [vmem:[%s3832_s6 + $0x18] sm:$0xff] }
 0x906   : > { %v2056_v40 = vmul.f32 %v2054_v37, %v4210_v51  ;;  %2446 = vmatpush.bf16.msrb.mxu3 %v3314_v27  ;;  %v3321_v37 = vld [vmem:[%s3832_s6 + $0x58] sm:$0xff] }
 0x907   : > { %2461 = vmatpush.bf16.msrb.mxu2 %v3321_v37 }
 0x908   : > { %v2061_v42 = vmul.f32 %v3415_v34, %v2056_v40 }
 0x90a   : > { %v2066_v8 = vadd.f32 %v3416_v39, %v2061_v42  ;;  %2447 = vmatpush.bf16.msrb.mxu3 %v3313_v35 }
 0x90c   : > { %v2067_v44 = vpack.c.bf16 %v2066_v8, %v2065_v28 }
 0x90e   : > { %3142 = vmatmul.msk.bf16.vlgmr.msra.gmra.mxu0 %vm1359_vm1, %v2067_v44  ;;  %3143 = vmatmul.msk.bf16.vlgmr.msra.gmra.mxu1 %vm1359_vm1, %v2067_v44 }
 0x98b   : > { %v2134_v47 = vpop.f32.mrf.mxu0  ;;  %v2148_v49 = vpop.f32.mrf.mxu1 }
 0x98c   : > { %v4248_v52 = vadd.f32 %v2134_v47, %v2078_v46  ;;  %v4250_v54 = vadd.f32 %v2148_v49, %v2079_v30 }
 0x98e   : > { %v4253_v51 = vmul.f32 0.70710677, %v4248_v52  ;;  %v4256_v55 = vmul.f32 0.70710677, %v4250_v54 }
 0x990   : > { %v4259_v56 = vand.u32 2147483647, %v4253_v51  ;;  %v4262_v58 = vand.u32 2147483647, %v4256_v55 }
 0x992   : > { %v2165_v59 = vmul.f32 0.3275911, %v4259_v56  ;;  %v2166_v41 = vmul.f32 0.3275911, %v4262_v58  ;;  %v2269_v50 = vsub.f32 0.0, %v4259_v56  ;;  %v2270_v24 = vsub.f32 0.0, %v4262_v58 }
 0x993   : > { %v2136_v60 = vpop.f32.mrf.mxu0  ;;  %v2150_v61 = vpop.f32.mrf.mxu1 }
 0x994   : > { %v2169_v63 = vadd.f32 1.0, %v2165_v59  ;;  %v4266_v0 = vadd.f32 1.0, %v2166_v41  ;;  %v4270_v3 = vadd.f32 %v2136_v60, %v2078_v46  ;;  %v4272_v5 = vadd.f32 %v2150_v61, %v2079_v30  ;;  %v3320_v59 = vld [vmem:[%s3832_s6 + $0x50] sm:$0xff] }
 0x995   : > { %v2273_v4 = vmul.f32 %v2269_v50, %v4259_v56  ;;  %v2274_v8 = vmul.f32 %v2270_v24, %v4262_v58  ;;  %v3312_v56 = vld [vmem:[%s3832_s6 + $0x10] sm:$0xff]  ;;  %2462 = vmatpush.bf16.msrb.mxu2 %v3320_v59 }
 0x996   : > { %3460 = vrcp.f32 %v2169_v63  ;;  %v4277_v6 = vmul.f32 0.70710677, %v4270_v3  ;;  %v4281_v9 = vmul.f32 0.70710677, %v4272_v5  ;;  %v2182_v20 = vand.u32 2147483647, %v2169_v63  ;;  %2448 = vmatpush.bf16.msrb.mxu3 %v3312_v56 }
 0x997   : > { %3462 = vrcp.f32 %v4266_v0  ;;  %v2184_v22 = vand.u32 2147483648, %v2169_v63  ;;  %v2199_v25 = vand.u32 2147483648, %v4266_v0  ;;  %v2197_v32 = vand.u32 2147483647, %v4266_v0 }
 0x998   : > { %v4284_v10 = vand.u32 2147483647, %v4277_v6  ;;  %v4287_v12 = vand.u32 2147483647, %v4281_v9  ;;  %vm2178_vm6 = vweird.f32 %v2169_v63  ;;  %vm2193_vm8 = vweird.f32 %v4266_v0 }
 0x999   : > { %v2185_v34 = vor.u32 1.1754944e-38, %v2184_v22  ;;  %vm2183_vm10 = vcmp.eq.f32.partialorder %v2182_v20, 8.507059e+37  ;;  %v2200_v40 = vor.u32 1.1754944e-38, %v2199_v25  ;;  %vm2198_vm12 = vcmp.eq.f32.partialorder %v2197_v32, 8.507059e+37  ;;  %v3310_v25 = vld [vmem:[%s3832_s6] sm:$0xff] }
 0x99a   : > { %v2167_v18 = vmul.f32 0.3275911, %v4284_v10  ;;  %v2168_v45 = vmul.f32 0.3275911, %v4287_v12  ;;  %v2277_v60 = vmul.f32 1.442695, %v2273_v4 }
 0x99b   : > { %v2271_v50 = vsub.f32 0.0, %v4284_v10  ;;  %v2272_v37 = vsub.f32 0.0, %v4287_v12 }
 0x99c   : > { %v3461_v11 = vpop.eup %3460  ;;  %v4295_v21 = vadd.f32 1.0, %v2167_v18  ;;  %v4298_v26 = vadd.f32 1.0, %v2168_v45 }
 0x99d   : > { %v3463_v16 = vpop.eup %3462  ;;  %v2174_v17 = vmul.f32 %v3461_v11, %v2169_v63  ;;  %vm2179_vm4 = vweird.f32 %v3461_v11  ;;  %v2279_v63 = vmul.f32 1.442695, %v2274_v8  ;;  %v2275_v8 = vmul.f32 %v2271_v50, %v4284_v10 }
 0x99e   : > { %v2189_v48 = vmul.f32 %v3463_v16, %v4266_v0  ;;  %3464 = vrcp.f32 %v4295_v21  ;;  %vm2194_vm5 = vweird.f32 %v3463_v16  ;;  %vm2180_vm7 = vmor %vm2178_vm6, %vm2179_vm4  ;;  %v2212_v2 = vand.u32 2147483647, %v4295_v21 }
 0x99f   : > { %v2175_v19 = vsub.f32 1.0, %v2174_v17  ;;  %3466 = vrcp.f32 %v4298_v26  ;;  %vm2195_vm11 = vmor %vm2193_vm8, %vm2194_vm5  ;;  %v2214_v53 = vand.u32 2147483648, %v4295_v21  ;;  %v2229_v15 = vand.u32 2147483648, %v4298_v26  ;;  %v3319_v17 = vld [vmem:[%s3832_s6 + $0x48] sm:$0xff] }
 0x9a0   : > { %v2190_v23 = vsub.f32 1.0, %v2189_v48  ;;  %v2227_v45 = vand.u32 2147483647, %v4298_v26  ;;  %vm2208_vm14 = vweird.f32 %v4295_v21  ;;  %vm2223_vm0 = vweird.f32 %v4298_v26  ;;  %2463 = vmatpush.bf16.msrb.mxu2 %v3319_v17 }
 0x9a1   : > { %v2176_v57 = vmul.f32 %v3461_v11, %v2175_v19  ;;  %vm2213_vm2 = vcmp.eq.f32.partialorder %v2212_v2, 8.507059e+37  ;;  %3468 = vpow2.f32 %v2277_v60  ;;  %vm2293_vm5 = vcmp.lt.f32.partialorder %v4253_v51, 0.0 }
 0x9a2   : > { %v2191_v31 = vmul.f32 %v3463_v16, %v2190_v23  ;;  %v2215_v23 = vor.u32 1.1754944e-38, %v2214_v53  ;;  %vm2228_vm4 = vcmp.eq.f32.partialorder %v2227_v45, 8.507059e+37  ;;  %3470 = vpow2.f32 %v2279_v63 }
 0x9a3   : > { %v2177_v33 = vadd.f32 %v3461_v11, %v2176_v57  ;;  %v2230_v57 = vor.u32 1.1754944e-38, %v2229_v15  ;;  %vm2294_vm6 = vcmp.lt.f32.partialorder %v4256_v55, 0.0  ;;  %vm2296_vm8 = vcmp.lt.f32.partialorder %v4281_v9, 0.0 }
 0x9a4   : > { %v2192_v13 = vadd.f32 %v3463_v16, %v2191_v31  ;;  %v3465_v44 = vpop.eup %3464  ;;  %v2155_v51 = vmul.f32 0.5, %v4270_v3  ;;  %v2154_v55 = vmul.f32 0.5, %v4250_v54  ;;  %v3417_v3 = vld [vmem:[%s837_s21] ss:$0 sm:$0xff] }
 0x9a5   : > { %v2181_v39 = vsel %vm2180_vm7, %v3461_v11, %v2177_v33  ;;  %v3467_v30 = vpop.eup %3466  ;;  %v2204_v49 = vmul.f32 %v3465_v44, %v4295_v21  ;;  %vm2209_vm13 = vweird.f32 %v3465_v44  ;;  %v3318_v21 = vld [vmem:[%s3832_s6 + $0x40] sm:$0xff]  ;;  %vm2295_vm7 = vcmp.lt.f32.partialorder %v4277_v6, 0.0 }
 0x9a6   : > { %v4311_v42 = vsel %vm2183_vm10, %v2185_v34, %v2181_v39  ;;  %v2196_v28 = vsel %vm2195_vm11, %v3463_v16, %v2192_v13  ;;  %v2219_v58 = vmul.f32 %v3467_v30, %v4298_v26  ;;  %v3311_v16 = vld [vmem:[%s3832_s6 + $0x8] sm:$0xff]  ;;  %vm2224_vm9 = vweird.f32 %v3467_v30  ;;  %vm2210_vm15 = vmor %vm2208_vm14, %vm2209_vm13  ;;  %2464 = vmatpush.bf16.msrb.mxu2 %v3318_v21 }
 0x9a7   : > { %v2233_v62 = vmul.f32 1.0614054, %v4311_v42  ;;  %v4315_v46 = vsel %vm2198_vm12, %v2200_v40, %v2196_v28  ;;  %v2205_v0 = vsub.f32 1.0, %v2204_v49  ;;  %2449 = vmatpush.bf16.msrb.mxu3 %v3311_v16  ;;  %vm2225_vm3 = vmor %vm2223_vm0, %vm2224_vm9  ;;  %v3469_v60 = vpop.eup %3468 }
 0x9a8   : > { %v2234_v47 = vmul.f32 1.0614054, %v4315_v46  ;;  %v2220_v7 = vsub.f32 1.0, %v2219_v58  ;;  %v2281_v58 = vmul.f32 1.442695, %v2275_v8 }
 0x9a9   : > { %v2237_v41 = vadd.f32 -1.4531521, %v2233_v62  ;;  %v2206_v14 = vmul.f32 %v3465_v44, %v2205_v0  ;;  %v3471_v0 = vpop.eup %3470 }
 0x9aa   : > { %v2238_v61 = vadd.f32 -1.4531521, %v2234_v47  ;;  %v2221_v48 = vmul.f32 %v3467_v30, %v2220_v7  ;;  %v2276_v47 = vmul.f32 %v2272_v37, %v4287_v12  ;;  %3472 = vpow2.f32 %v2281_v58 }
 0x9ab   : > { %v2241_v1 = vmul.f32 %v2237_v41, %v4311_v42  ;;  %v2207_v20 = vadd.f32 %v3465_v44, %v2206_v14  ;;  %2450 = vmatpush.bf16.msrb.mxu3 %v3310_v25 }
 0x9ac   : > { %v2242_v11 = vmul.f32 %v2238_v61, %v4315_v46  ;;  %v2222_v24 = vadd.f32 %v3467_v30, %v2221_v48  ;;  %v2283_v2 = vmul.f32 1.442695, %v2276_v47 }
 0x9ad   : > { %v2245_v18 = vadd.f32 1.4214138, %v2241_v1  ;;  %v2211_v29 = vsel %vm2210_vm15, %v3465_v44, %v2207_v20 }
 0x9ae   : > { %v2246_v19 = vadd.f32 1.4214138, %v2242_v11  ;;  %v2216_v32 = vsel %vm2213_vm2, %v2215_v23, %v2211_v29  ;;  %v2226_v33 = vsel %vm2225_vm3, %v3467_v30, %v2222_v24  ;;  %3474 = vpow2.f32 %v2283_v2 }
 0x9af   : > { %v2249_v22 = vmul.f32 %v2245_v18, %v4311_v42  ;;  %v2235_v13 = vmul.f32 1.0614054, %v2216_v32  ;;  %v2231_v35 = vsel %vm2228_vm4, %v2230_v57, %v2226_v33  ;;  %v2153_v33 = vmul.f32 0.5, %v4248_v52 }
 0x9b0   : > { %v2250_v27 = vmul.f32 %v2246_v19, %v4315_v46  ;;  %v2236_v39 = vmul.f32 1.0614054, %v2231_v35  ;;  %v3473_v48 = vpop.eup %3472 }
 0x9b1   : > { %v2253_v31 = vadd.f32 -0.28449672, %v2249_v22  ;;  %v2239_v40 = vadd.f32 -1.4531521, %v2235_v13 }
 0x9b2   : > { %v2254_v34 = vadd.f32 -0.28449672, %v2250_v27  ;;  %v2240_v44 = vadd.f32 -1.4531521, %v2236_v39 }
 0x9b3   : > { %v2257_v26 = vmul.f32 %v2253_v31, %v4311_v42  ;;  %v2243_v30 = vmul.f32 %v2239_v40, %v2216_v32 }
 0x9b4   : > { %v2258_v4 = vmul.f32 %v2254_v34, %v4315_v46  ;;  %v2244_v56 = vmul.f32 %v2240_v44, %v2231_v35  ;;  %v3475_v20 = vpop.eup %3474 }
 0x9b5   : > { %v2261_v28 = vadd.f32 0.2548296, %v2257_v26  ;;  %v2247_v41 = vadd.f32 1.4214138, %v2243_v30 }
 0x9b6   : > { %v2262_v62 = vadd.f32 0.2548296, %v2258_v4  ;;  %v2248_v61 = vadd.f32 1.4214138, %v2244_v56 }
 0x9b7   : > { %v2265_v49 = vmul.f32 %v2261_v28, %v4311_v42  ;;  %v2251_v1 = vmul.f32 %v2247_v41, %v2216_v32 }
 0x9b8   : > { %v2266_v59 = vmul.f32 %v2262_v62, %v4315_v46  ;;  %v2252_v10 = vmul.f32 %v2248_v61, %v2231_v35 }
 0x9b9   : > { %v2285_v63 = vmul.f32 %v3469_v60, %v2265_v49  ;;  %v2255_v7 = vadd.f32 -0.28449672, %v2251_v1 }
 0x9ba   : > { %v2286_v53 = vmul.f32 %v3471_v0, %v2266_v59  ;;  %v2256_v11 = vadd.f32 -0.28449672, %v2252_v10 }
 0x9bb   : > { %v2289_v14 = vsub.f32 1.0, %v2285_v63  ;;  %v2259_v12 = vmul.f32 %v2255_v7, %v2216_v32 }
 0x9bc   : > { %v2290_v42 = vsub.f32 1.0, %v2286_v53  ;;  %v2260_v15 = vmul.f32 %v2256_v11, %v2231_v35 }
 0x9bd   : > { %v2263_v16 = vadd.f32 0.2548296, %v2259_v12  ;;  %v2297_v17 = vsub.f32 0.0, %v2289_v14 }
 0x9be   : > { %v2264_v46 = vadd.f32 0.2548296, %v2260_v15  ;;  %v2298_v45 = vsub.f32 0.0, %v2290_v42 }
 0x9bf   : > { %v2267_v18 = vmul.f32 %v2263_v16, %v2216_v32  ;;  %v2301_v23 = vsel %vm2293_vm5, %v2297_v17, %v2289_v14 }
 0x9c0   : > { %v2268_v19 = vmul.f32 %v2264_v46, %v2231_v35  ;;  %v2302_v27 = vsel %vm2294_vm6, %v2298_v45, %v2290_v42  ;;  %v2305_v25 = vadd.f32 1.0, %v2301_v23  ;;  %v2156_v35 = vmul.f32 0.5, %v4272_v5 }
 0x9c1   : > { %v2287_v50 = vmul.f32 %v3473_v48, %v2267_v18  ;;  %v2306_v31 = vadd.f32 1.0, %v2302_v27 }
 0x9c2   : > { %v2288_v22 = vmul.f32 %v3475_v20, %v2268_v19  ;;  %v2309_v26 = vmul.f32 %v2305_v25, %v2153_v33 }
 0x9c3   : > { %v2291_v24 = vsub.f32 1.0, %v2287_v50  ;;  %v2310_v6 = vmul.f32 %v2306_v31, %v2154_v55 }
 0x9c4   : > { %v2292_v29 = vsub.f32 1.0, %v2288_v22 }
 0x9c5   : > { %v2299_v57 = vsub.f32 0.0, %v2291_v24 }
 0x9c6   : > { %v2300_v21 = vsub.f32 0.0, %v2292_v29 }
 0x9c7   : > { %v2303_v32 = vsel %vm2295_vm7, %v2299_v57, %v2291_v24 }
 0x9c8   : > { %v2307_v34 = vadd.f32 1.0, %v2303_v32  ;;  %v2304_v13 = vsel %vm2296_vm8, %v2300_v21, %v2292_v29 }
 0x9c9   : > { %v2308_v37 = vadd.f32 1.0, %v2304_v13 }
 0x9ca   : > { %v2311_v39 = vmul.f32 %v2307_v34, %v2155_v51 }
 0x9cb   : > { %v2312_v4 = vmul.f32 %v2308_v37, %v2156_v35 }
 0x9cc   : > { %v2313_v40 = vpack.c.bf16 %v2311_v39, %v2309_v26 }
 0x9cd   : > { %v2314_v28 = vpack.c.bf16 %v2312_v4, %v2310_v6 }
 0x9ce   : > { %2451 = vmatmul.bf16.vlgmr.msrb.gmra.mxu3 %v2313_v40 }
 0x9cf   : > { %2465 = vmatmul.bf16.vlgmr.msrb.gmra.mxu2 %v2314_v28 }
 0xa51   : > { %v2452_v9 = vpop.f32.mrf.mxu3 }
 0xa52   : > { %v2466_v52 = vpop.f32.mrf.mxu2 }
 0xa53   : > { %v2467_v8 = vadd.f32 %v2466_v52, %v2452_v9 }
 0xa55   : > { %v2471_v54 = vadd.f32 %v2467_v8, %v4192_v36 }
 0xa57   : > { %v2477_v5 = vadd.f32 %v3417_v3, %v2471_v54 }
 0xa59   : > { %2479 = vst.msk [vmem:[#allocation2] sm:$0xff] %vm1359_vm1, %v2477_v5  ;;  %v2454_v44 = vpop.f32.mrf.mxu3 }
 0xa5a   : > { %v2468_v62 = vpop.f32.mrf.mxu2 }
 0xa5b   : > { %v2469_v30 = vadd.f32 %v2468_v62, %v2454_v44 }
 0xa5d   : > { %v2472_v47 = vadd.f32 %v2469_v30, %v4197_v43  ;;  %2484 = sbr.rel (%p3208_p1) target bundleno = 3073 (0xc01), region = 108 }
 0xa5f   : > { %v2478_v49 = vadd.f32 %v3417_v3, %v2472_v47 }
 0xa61   : > { %2480 = vst.msk [vmem:[#allocation2 + $0x8] sm:$0xff] %vm1359_vm1, %v2478_v49 }
 0xa62   : > { %v2487_v56 = vsel %vm1359_vm1, %v2477_v5, 0.0  ;;  %v2490_v59 = vsel %vm1359_vm1, %v2478_v49, 0.0  ;;  %v3329_v53 = vld [vmem:[%s4536_s20 + $0x18] sm:$0xff]  ;;  %v3328_v10 = vld [vmem:[%s4536_s20 + $0x10] sm:$0xff]  ;;  %v3327_v7 = vld [vmem:[%s4536_s20 + $0x8] sm:$0xff]  ;;  %vm2595_vm15 = vcmask 257024  }
 0xa63   : > { %2488 = vadd.xlane.f32.xlu0 %v2487_v56  ;;  %2585 = vmatpush.bf16.msra.mxu0 %v3329_v53  ;;  %v3326_v14 = vld [vmem:[%s4536_s20] sm:$0xff] }
 0xa64   : > { %v3477_v33 = vld [vmem:[%s4538_s2] ss:$0 sm:$0xff] }
 0xa65   : > { %v3478_v35 = vld [vmem:[%s4539_s17] ss:$0 sm:$0xff] }
 0xa67   : > { %2586 = vmatpush.bf16.msra.mxu0 %v3328_v10 }
 0xa6b   : > { %2491 = vadd.xlane.f32.xlu0 %v2490_v59  ;;  %2587 = vmatpush.bf16.msra.mxu0 %v3327_v7 }
 0xa6f   : > { %2588 = vmatpush.bf16.msra.mxu0 %v3326_v14 }
 0xad6   : > { %v2489_v36 = vpop.xlane.xlu0 %2488 }
 0xad7   : > { %v2493_v41 = vmul.f32 %v2489_v36, %v4007_v38 }
 0xad9   : > { %v2495_v60 = vsub.f32 %v2477_v5, %v2493_v41 }
 0xadb   : > { %v2497_v58 = vmul.f32 %v2495_v60, %v2495_v60 }
 0xadd   : > { %v2499_v61 = vsel %vm1359_vm1, %v2497_v58, 0.0 }
 0xade   : > { %2500 = vadd.xlane.f32.xlu1 %v2499_v61  ;;  %v2492_v43 = vpop.xlane.xlu0 %2491 }
 0xadf   : > { %v2494_v0 = vmul.f32 %v2492_v43, %v4007_v38 }
 0xae1   : > { %v2496_v63 = vsub.f32 %v2478_v49, %v2494_v0 }
 0xae3   : > { %v2498_v1 = vmul.f32 %v2496_v63, %v2496_v63 }
 0xae5   : > { %v2502_v2 = vsel %vm1359_vm1, %v2498_v1, 0.0 }
 0xae6   : > { %2503 = vadd.xlane.f32.xlu1 %v2502_v2 }
 0xb51   : > { %v2501_v11 = vpop.xlane.xlu1 %2500 }
 0xb52   : > { %v2505_v12 = vmul.f32 %v2501_v11, %v4007_v38 }
 0xb54   : > { %v2507_v42 = vadd.f32 1e-06, %v2505_v12 }
 0xb56   : > { %3479 = vrsqrt.f32 %v2507_v42  ;;  %vm2515_vm11 = vweird.f32 %v2507_v42 }
 0xb59   : > { %v2504_v15 = vpop.xlane.xlu1 %2503 }
 0xb5a   : > { %v2506_v16 = vmul.f32 %v2504_v15, %v4007_v38  ;;  %v3476_v38 = vld [vmem:[%s4537_s23] ss:$0 sm:$0xff] }
 0xb5c   : > { %v3480_v46 = vpop.eup %3479  ;;  %v2508_v17 = vadd.f32 1e-06, %v2506_v16 }
 0xb5d   : > { %v2510_v18 = vmul.f32 %v3480_v46, %v2507_v42  ;;  %vm2516_vm10 = vweird.f32 %v3480_v46 }
 0xb5e   : > { %3481 = vrsqrt.f32 %v2508_v17  ;;  %vm2517_vm12 = vmor %vm2515_vm11, %vm2516_vm10  ;;  %vm2525_vm9 = vweird.f32 %v2508_v17 }
 0xb5f   : > { %v2511_v48 = vmul.f32 %v3480_v46, %v2510_v18 }
 0xb61   : > { %v2512_v45 = vmul.f32 0.5, %v2511_v48 }
 0xb63   : > { %v2513_v19 = vsub.f32 1.5, %v2512_v45 }
 0xb64   : > { %v3482_v20 = vpop.eup %3481 }
 0xb65   : > { %v2514_v50 = vmul.f32 %v3480_v46, %v2513_v19  ;;  %v2520_v22 = vmul.f32 %v3482_v20, %v2508_v17  ;;  %vm2526_vm13 = vweird.f32 %v3482_v20 }
 0xb66   : > { %vm2527_vm14 = vmor %vm2525_vm9, %vm2526_vm13 }
 0xb67   : > { %v2521_v23 = vmul.f32 %v3482_v20, %v2520_v22  ;;  %v2518_v27 = vsel %vm2517_vm12, %v3480_v46, %v2514_v50 }
 0xb68   : > { %v2529_v57 = vmul.f32 %v2518_v27, %v2495_v60 }
 0xb69   : > { %v2522_v24 = vmul.f32 0.5, %v2521_v23 }
 0xb6a   : > { %v2534_v32 = vmul.f32 %v3476_v38, %v2529_v57 }
 0xb6b   : > { %v2523_v29 = vsub.f32 1.5, %v2522_v24 }
 0xb6c   : > { %v2539_v34 = vadd.f32 %v3477_v33, %v2534_v32 }
 0xb6d   : > { %v2524_v25 = vmul.f32 %v3482_v20, %v2523_v29 }
 0xb6f   : > { %v2528_v21 = vsel %vm2527_vm14, %v3482_v20, %v2524_v25 }
 0xb70   : > { %v2530_v31 = vmul.f32 %v2528_v21, %v2496_v63 }
 0xb72   : > { %v2535_v51 = vmul.f32 %v3476_v38, %v2530_v31 }
 0xb74   : > { %v2540_v13 = vadd.f32 %v3477_v33, %v2535_v51 }
 0xb76   : > { %v2541_v55 = vpack.c.bf16 %v2540_v13, %v2539_v34 }
 0xb78   : > { %3225 = vmatmul.msk.bf16.vlgmr.msra.gmra.mxu0 %vm1359_vm1, %v2541_v55 }
 0xbf5   : > { %v2590_v37 = vpop.f32.mrf.mxu0 }
 0xbf6   : > { %v2591_v26 = vadd.f32 %v3478_v35, %v2590_v37 }
 0xbf8   : > { %2596 = vst.msk [vmem:[%s3834_s4] sm:$0xf] %vm2595_vm15, %v2591_v26 }
 0xbfd   : > { %v2592_v39 = vpop.f32.mrf.mxu0 }
 0xbfe   : > { %v2593_v6 = vadd.f32 %v3478_v35, %v2592_v39 }
 0xc00   : > { %3226 = vst.msk [vmem:[%s3834_s4 + $0x4] sm:$0xf] %vm2595_vm15, %v2593_v6 }
 0xc01 PF: > { %s4540_s0 = sld [smem:[#allocation10_spill]]  ;;  %s2612_s5 = sshll.u32 %s3834_s4, 4  ;;  %s2613_s5 = int_to_ptr.vmem [resolvable:$true] %s2612_s5 }
 0xc02   : > { %s4541_s21 = sld [smem:[#allocation7_spill]] }
 0xc03   : > { %s4543_s19 = sld [smem:[#allocation31_spill]] }
 0xc07   : > { %s3330_s16 = sshll.u32 %s4540_s0, 3 }
 0xc08   : > { %s4544_s23 = sand.u32 1, %s4541_s21  }
 0xc09   : > { %s2611_s3 = scalar_lea.hbm %s4543_s19, %s3330_s16  ;;  %s2600_s1 = scalar_lea.sflag [#allocation4], %s4544_s23 }
 0xc0a   : > { %s2614_s29 = sshll.u32 %s2611_s3, 4  ;;  %s3503_s17 = scalar_lea.hbm %s4543_s19, 16  ;;  %s2615_s29 = int_to_ptr.hbm [resolvable:$true] %s2614_s29 }
 0xc0b   : > { %s3497_s22 = sshra.s32 %s2615_s29, 4  ;;  %s3498_s22 = int_to_ptr.hbm [resolvable:$true] %s3497_s22 }
 0xc0c   : > { %s3499_s2 = scalar_lea.hbm %s3498_s22, 8  ;;  %p3504_p6 = scmp.lt.s32.totalorder %s3498_s22, %s4543_s19 }
 0xc0d   : > { %p3500_p2 = scmp.ne.s32.totalorder %s3498_s22, %s3499_s2  ;;  %p3505_p7 = scmp.lt.s32.totalorder %s3503_s17, %s3499_s2 }
 0xc0f   : > { %p3501_p4 = pnand %p3500_p2, %p3742_p3  ;;  %p3506_p8 = por %p3505_p7, %p3504_p6 }
 0xc11   : > { %p3502_p5 = pneg %p3501_p4 }
 0xc13   : > { %p3507_p10 = pnand %p3506_p8, %p3502_p5 }
 0xc15   : > { %3510 = shalt.err (!%p3507_p10)
}
 0xc16   : > { %s3587_s4 = smov 4  }
 0xc17   : > { %3332 = dma.vmem_to_hbm [thread:$0]  (%p3742_p3), %s2613_s5, 128, %s2615_s29, %s2600_s1, %s3580_s24, %s3580_s24, %s3587_s4  }
 0xc18 PF: > { %s4545_s21 = sld [smem:[#allocation13_spill]] }
 0xc19   : > { %s4546_s16 = sld [smem:[#allocation6_spill]] }
 0xc1e   : > { %p3338_p11 = scmp.ge.s32.totalorder %s4545_s21, 2 }
 0xc1f   : > { %s2629_s3 = sand.u32 1, %s4546_s16  }
 0xc20   : > { %p3335_p12 = pnand %p3338_p11, %p3752_p9  ;;  %s2630_s23 = scalar_lea.sflag [#allocation4], %s2629_s3 }
 0xc22   : > { %p3336_p13 = pneg %p3335_p12 }
 0xc24   : > { %3544 = dma.done.wait (%p3336_p13), %s2630_s23, 128  }
 0xc25   : > { %3546 = vsyncadd (%p3336_p13), %s2630_s23, 4294967168  ;;  %s33_s26 = sadd.s32 1, %s4545_s21   ;;  %s4548_s1 = sld [smem:[#allocation7_spill]] }
 0xc26   : > { %p30_p0 = scmp.ge.s32.totalorder %s33_s26, 6   ;;  %s4549_s22 = sld [smem:[#allocation8_spill]] }
 0xc27   : > { %s4550_s23 = sld [smem:[#allocation18_spill]] }
 0xc28   : > { %s4551_s24 = sld [smem:[#allocation11_spill]]  ;;  %32 = sbr.rel (!%p30_p0) target bundleno = 19 (0x13), region = 180 }
 0xc29   : > { %s4552_s2 = sld [smem:[#allocation12_spill]] }
 0xc2a   : > { %s4553_s25 = sld [smem:[#allocation14_spill]] }
 0xc2b   : > { %s4554_s3 = sld [smem:[#allocation16_spill]] }
 0xc2d   :  { %2636 = vsyncpa [#allocation4], 1 }
 0xc2e   :  { %2638 = vsyncpa [#allocation4 + $0x1], 1 }

</bundles_post_ra>
